<compile_context>
chip_gen: v6e
topology: v6e:2x2x1
jax: 0.10.0
libtpu: 0.0.40
codegen_flags: <defaults>
</compile_context>

<pallas_src>
import math

import jax
import jax.numpy as jnp
import numpy as np
from jax.experimental import pallas as pl
from jax.experimental.pallas import tpu as pltpu

# ---------------- config ----------------
BATCH = 2
SEQ = 8
HIDDEN = 64
NUM_HEADS = 4
HEAD_DIM = HIDDEN // NUM_HEADS          # 16
NUM_KV_HEADS = 2
NUM_KV_GROUPS = NUM_HEADS // NUM_KV_HEADS
PARTIAL_ROTARY_FACTOR = 0.25
ROTARY_DIM = int(PARTIAL_ROTARY_FACTOR * HEAD_DIM)   # 4
ROPE_THETA = 10000.0
USE_QKV_BIAS = True
QK_LAYERNORM = True
LAYER_NORM_EPS = 1e-5

Q_DIM = NUM_HEADS * HEAD_DIM            # 64
KV_DIM = NUM_KV_HEADS * HEAD_DIM        # 32
QKV_DIM = Q_DIM + 2 * KV_DIM            # 128 (exactly lane-dense)
NEG_INF = -1e30


# ---------------- fused Pallas kernel ----------------
def _fused_attn_kernel(x_ref, wqkv_ref, bqkv_ref,
                       qlnw_ref, qlnb_ref, klnw_ref, klnb_ref,
                       mq_ref, mk_ref, rq_ref, rk_ref,
                       cosq_ref, sinq_ref, cosk_ref, sink_ref,
                       mask_ref, wo_ref, o_ref):
    # One program per batch element; everything stays in VMEM.
    x = x_ref[0]                                                   # (S, H)

    # Fused QKV projection: (S, H) @ (H, 128) + bias -> lane-dense 128 output.
    qkv = jnp.dot(x, wqkv_ref[...],
                  preferred_element_type=jnp.float32) + bqkv_ref[...]
    q = qkv[:, :Q_DIM]                                             # (S, 64)
    k = qkv[:, Q_DIM:Q_DIM + KV_DIM]                               # (S, 32)
    v = qkv[:, Q_DIM + KV_DIM:]                                    # (S, 32)

    # Per-head layernorm kept in the flat (S, NH*D) layout: per-head means /
    # variances come from block-diagonal averaging matmuls (no reshapes).
    def head_layernorm(t, m_ref, w_ref, b_ref):
        mean = jnp.dot(t, m_ref[...], preferred_element_type=jnp.float32)
        c = t - mean
        var = jnp.dot(c * c, m_ref[...], preferred_element_type=jnp.float32)
        return c * jax.lax.rsqrt(var + LAYER_NORM_EPS) * w_ref[...] + b_ref[...]

    if QK_LAYERNORM:
        q = head_layernorm(q, mq_ref, qlnw_ref, qlnb_ref)
        k = head_layernorm(k, mk_ref, klnw_ref, klnb_ref)

    # Partial RoPE as  x*cos + (x @ R)*sin  with block-diagonal rotate-half
    # matrix R; pass-through dims have cos=1/sin=0.  The 1/sqrt(head_dim)
    # attention scale is pre-folded into cosq/sinq (RoPE is linear in q).
    q = q * cosq_ref[...] + jnp.dot(
        q, rq_ref[...], preferred_element_type=jnp.float32) * sinq_ref[...]
    k = k * cosk_ref[...] + jnp.dot(
        k, rk_ref[...], preferred_element_type=jnp.float32) * sink_ref[...]

    mask = mask_ref[...]                                           # (S, S) additive

    outs = []
    for h in range(NUM_HEADS):                                     # static unroll
        g = h // NUM_KV_GROUPS                                     # GQA mapping
        q_h = q[:, h * HEAD_DIM:(h + 1) * HEAD_DIM]                # (S, D)
        k_g = k[:, g * HEAD_DIM:(g + 1) * HEAD_DIM]                # (S, D)
        v_g = v[:, g * HEAD_DIM:(g + 1) * HEAD_DIM]                # (S, D)
        s = jnp.dot(q_h, k_g.T, preferred_element_type=jnp.float32) + mask
        m = jnp.max(s, axis=-1, keepdims=True)
        p = jnp.exp(s - m)
        inv = pl.reciprocal(jnp.sum(p, axis=-1, keepdims=True))
        o_h = jnp.dot(p, v_g, preferred_element_type=jnp.float32) * inv
        outs.append(o_h)
    attn = jnp.concatenate(outs, axis=-1)                          # (S, H)

    # o_proj (no bias).
    o_ref[0] = jnp.dot(attn, wo_ref[...], preferred_element_type=jnp.float32)


# ---------------- host-side constant tables ----------------
def _group_mean_matrix(num_heads, d):
    m = np.zeros((num_heads * d, num_heads * d), np.float32)
    for h in range(num_heads):
        m[h * d:(h + 1) * d, h * d:(h + 1) * d] = 1.0 / d
    return jnp.asarray(m)


def _rotate_half_matrix(num_heads, d, rot):
    # out = x @ R ; within each head's rotary slice [x0..x_{rot-1}]:
    #   out[i]        = -x[rot/2 + i]
    #   out[rot/2+i]  =  x[i]
    # pass-through dims map to 0 (their sin is 0 anyway).
    r = np.zeros((num_heads * d, num_heads * d), np.float32)
    half = rot // 2
    for h in range(num_heads):
        o = h * d
        for i in range(half):
            r[o + half + i, o + i] = -1.0
            r[o + i, o + half + i] = 1.0
    return jnp.asarray(r)


def _rope_tables(seq, num_heads, d, rot, base, scale=1.0):
    inv_freq = 1.0 / (base ** (np.arange(0, rot, 2, dtype=np.float32) / rot))
    t = np.arange(seq, dtype=np.float32)
    freqs = np.outer(t, inv_freq)                      # (S, rot/2)
    emb = np.concatenate([freqs, freqs], axis=-1)      # (S, rot)
    cos, sin = np.cos(emb), np.sin(emb)
    cos_full = np.ones((seq, num_heads * d), np.float32)
    sin_full = np.zeros((seq, num_heads * d), np.float32)
    for h in range(num_heads):
        cos_full[:, h * d:h * d + rot] = cos
        sin_full[:, h * d:h * d + rot] = sin
    return jnp.asarray(cos_full * scale), jnp.asarray(sin_full * scale)


def _causal_additive_mask(seq):
    m = np.where(np.tril(np.ones((seq, seq), bool)), 0.0, NEG_INF)
    return jnp.asarray(m.astype(np.float32))


# ---------------- forward ----------------
def stablelm_flash_attention2_forward(params, hidden_states):
    B, S, H = hidden_states.shape
    assert H == HIDDEN

    def _bias(b, n):
        return b if b is not None else jnp.zeros((n,), jnp.float32)

    # Fused lane-dense QKV weight / bias (output dim 64+32+32 = 128).
    wqkv_t = jnp.concatenate(
        [params["q_w"], params["k_w"], params["v_w"]], axis=0).T      # (H, 128)
    bqkv = jnp.concatenate(
        [_bias(params["q_b"], Q_DIM),
         _bias(params["k_b"], KV_DIM),
         _bias(params["v_b"], KV_DIM)]).reshape(1, QKV_DIM)

    qlnw = params["q_ln_w"].reshape(1, Q_DIM)
    qlnb = params["q_ln_b"].reshape(1, Q_DIM)
    klnw = params["k_ln_w"].reshape(1, KV_DIM)
    klnb = params["k_ln_b"].reshape(1, KV_DIM)

    scale = 1.0 / math.sqrt(HEAD_DIM)
    cosq, sinq = _rope_tables(S, NUM_HEADS, HEAD_DIM, ROTARY_DIM, ROPE_THETA,
                              scale=scale)   # scale folded into Q's tables
    cosk, sink = _rope_tables(S, NUM_KV_HEADS, HEAD_DIM, ROTARY_DIM, ROPE_THETA)
    mq = _group_mean_matrix(NUM_HEADS, HEAD_DIM)
    mk = _group_mean_matrix(NUM_KV_HEADS, HEAD_DIM)
    rq = _rotate_half_matrix(NUM_HEADS, HEAD_DIM, ROTARY_DIM)
    rk = _rotate_half_matrix(NUM_KV_HEADS, HEAD_DIM, ROTARY_DIM)
    mask = _causal_additive_mask(S)
    wo_t = params["o_w"].T

    def full(shape):
        return pl.BlockSpec(shape, lambda b, _n=len(shape): (0,) * _n)

    # TODO(synk): attention_mask padding, dropout>0, past_key_value cache and
    # kv_bit<16 pseudo-quantization are config-disabled here and not implemented.
    return pl.pallas_call(
        _fused_attn_kernel,
        out_shape=jax.ShapeDtypeStruct((B, S, H), jnp.float32),
        grid=(B,),
        in_specs=[
            pl.BlockSpec((1, S, H), lambda b: (b, 0, 0)),      # hidden_states
            full((H, QKV_DIM)), full((1, QKV_DIM)),            # wqkv_t, bqkv
            full((1, Q_DIM)), full((1, Q_DIM)),                # q ln w/b
            full((1, KV_DIM)), full((1, KV_DIM)),              # k ln w/b
            full((Q_DIM, Q_DIM)), full((KV_DIM, KV_DIM)),      # mean matrices
            full((Q_DIM, Q_DIM)), full((KV_DIM, KV_DIM)),      # rotate-half mats
            full((S, Q_DIM)), full((S, Q_DIM)),                # cosq, sinq
            full((S, KV_DIM)), full((S, KV_DIM)),              # cosk, sink
            full((S, S)),                                      # causal mask
            full((H, H)),                                      # wo_t
        ],
        out_specs=pl.BlockSpec((1, S, H), lambda b: (b, 0, 0)),
        compiler_params=pltpu.CompilerParams(
            dimension_semantics=("parallel",)),
    )(hidden_states, wqkv_t, bqkv, qlnw, qlnb, klnw, klnb,
      mq, mk, rq, rk, cosq, sinq, cosk, sink, mask, wo_t)


# ---------------- deterministic parameter init ----------------
def init_params(key):
    ks = jax.random.split(key, 7)

    def w(k, shape, scale=0.05):
        return (scale * jax.random.normal(k, shape)).astype(jnp.float32)

    return {
        "q_w": w(ks[0], (Q_DIM, HIDDEN)),
        "q_b": w(ks[1], (Q_DIM,)) if USE_QKV_BIAS else None,
        "k_w": w(ks[2], (KV_DIM, HIDDEN)),
        "k_b": w(ks[3], (KV_DIM,)) if USE_QKV_BIAS else None,
        "v_w": w(ks[4], (KV_DIM, HIDDEN)),
        "v_b": w(ks[5], (KV_DIM,)) if USE_QKV_BIAS else None,
        "o_w": w(ks[6], (HIDDEN, HIDDEN)),
        # torch LayerNorm default init: weight=1, bias=0 (per head)
        "q_ln_w": jnp.ones((NUM_HEADS, HEAD_DIM), jnp.float32),
        "q_ln_b": jnp.zeros((NUM_HEADS, HEAD_DIM), jnp.float32),
        "k_ln_w": jnp.ones((NUM_KV_HEADS, HEAD_DIM), jnp.float32),
        "k_ln_b": jnp.zeros((NUM_KV_HEADS, HEAD_DIM), jnp.float32),
    }


# ---------------- pure-JAX reference for validation ----------------
def _per_head_layernorm_ref(x, weight, bias, eps):
    mean = jnp.mean(x, axis=-1, keepdims=True)
    var = jnp.mean((x - mean) ** 2, axis=-1, keepdims=True)
    xn = (x - mean) / jnp.sqrt(var + eps)
    return xn * weight[None, :, None, :] + bias[None, :, None, :]


def _rotary_cos_sin_ref(seq_len, dim, base):
    inv_freq = 1.0 / (base ** (jnp.arange(0, dim, 2, dtype=jnp.float32) / dim))
    t = jnp.arange(seq_len, dtype=jnp.float32)
    freqs = jnp.outer(t, inv_freq)
    emb = jnp.concatenate([freqs, freqs], axis=-1)
    return jnp.cos(emb), jnp.sin(emb)


def _rotate_half_ref(x):
    x1, x2 = jnp.split(x, 2, axis=-1)
    return jnp.concatenate([-x2, x1], axis=-1)


def reference_forward(params, hidden_states):
    B, S, H = hidden_states.shape
    q = hidden_states @ params["q_w"].T + params["q_b"]
    k = hidden_states @ params["k_w"].T + params["k_b"]
    v = hidden_states @ params["v_w"].T + params["v_b"]
    q = q.reshape(B, S, NUM_HEADS, HEAD_DIM).transpose(0, 2, 1, 3)
    k = k.reshape(B, S, NUM_KV_HEADS, HEAD_DIM).transpose(0, 2, 1, 3)
    v = v.reshape(B, S, NUM_KV_HEADS, HEAD_DIM).transpose(0, 2, 1, 3)
    if QK_LAYERNORM:
        q = _per_head_layernorm_ref(q, params["q_ln_w"], params["q_ln_b"],
                                    LAYER_NORM_EPS)
        k = _per_head_layernorm_ref(k, params["k_ln_w"], params["k_ln_b"],
                                    LAYER_NORM_EPS)
    cos, sin = _rotary_cos_sin_ref(S, ROTARY_DIM, ROPE_THETA)
    cos = cos[None, None, :, :]
    sin = sin[None, None, :, :]
    q_rot, q_pass = q[..., :ROTARY_DIM], q[..., ROTARY_DIM:]
    k_rot, k_pass = k[..., :ROTARY_DIM], k[..., ROTARY_DIM:]
    q_rot = q_rot * cos + _rotate_half_ref(q_rot) * sin
    k_rot = k_rot * cos + _rotate_half_ref(k_rot) * sin
    q = jnp.concatenate([q_rot, q_pass], axis=-1)
    k = jnp.concatenate([k_rot, k_pass], axis=-1)
    k = jnp.repeat(k, NUM_KV_GROUPS, axis=1)
    v = jnp.repeat(v, NUM_KV_GROUPS, axis=1)
    scores = jnp.einsum("bhqd,bhkd->bhqk", q, k) / math.sqrt(HEAD_DIM)
    mask = jnp.tril(jnp.ones((S, S), dtype=bool))
    scores = jnp.where(mask[None, None], scores, -jnp.inf)
    p = jax.nn.softmax(scores.astype(jnp.float32), axis=-1)
    o = jnp.einsum("bhqk,bhkd->bhqd", p, v)
    o = o.transpose(0, 2, 1, 3).reshape(B, S, HIDDEN)
    return o @ params["o_w"].T


if __name__ == "__main__":
    key = jax.random.PRNGKey(0)
    pkey, xkey = jax.random.split(key)
    params = init_params(pkey)
    hidden_states = jax.random.normal(xkey, (BATCH, SEQ, HIDDEN),
                                      dtype=jnp.float32)

    out = stablelm_flash_attention2_forward(params, hidden_states)
    out = jax.block_until_ready(out)

    ref = reference_forward(params, hidden_states)
    np.testing.assert_allclose(np.asarray(out), np.asarray(ref),
                               atol=1e-4, rtol=1e-4)

    print("KERNEL_OK")
</pallas_src>

<mosaic_0001>
module attributes {stable_mosaic.version = 11 : i64} {
  func.func @_fused_attn_kernel(%arg0: i32, %arg1: memref<1x8x64xf32, #tpu.memory_space<vmem>>, %arg2: memref<64x128xf32, #tpu.memory_space<vmem>>, %arg3: memref<1x128xf32, #tpu.memory_space<vmem>>, %arg4: memref<1x64xf32, #tpu.memory_space<vmem>>, %arg5: memref<1x64xf32, #tpu.memory_space<vmem>>, %arg6: memref<1x32xf32, #tpu.memory_space<vmem>>, %arg7: memref<1x32xf32, #tpu.memory_space<vmem>>, %arg8: memref<64x64xf32, #tpu.memory_space<vmem>>, %arg9: memref<32x32xf32, #tpu.memory_space<vmem>>, %arg10: memref<64x64xf32, #tpu.memory_space<vmem>>, %arg11: memref<32x32xf32, #tpu.memory_space<vmem>>, %arg12: memref<8x64xf32, #tpu.memory_space<vmem>>, %arg13: memref<8x64xf32, #tpu.memory_space<vmem>>, %arg14: memref<8x32xf32, #tpu.memory_space<vmem>>, %arg15: memref<8x32xf32, #tpu.memory_space<vmem>>, %arg16: memref<8x8xf32, #tpu.memory_space<vmem>>, %arg17: memref<64x64xf32, #tpu.memory_space<vmem>>, %arg18: memref<1x8x64xf32, #tpu.memory_space<vmem>>) attributes {dimension_semantics = [#tpu.dimension_semantics<parallel>], iteration_bounds = array<i64: 2>, scalar_prefetch = 0 : i64, scratch_operands = 0 : i64, tpu.core_type = #tpu.core_type<tc>, window_params = [{transform_indices = @transform_0, window_bounds = array<i64: 1, 8, 64>}, {pipeline_mode = #tpu.pipeline_mode<synchronous>, transform_indices = @transform_1, window_bounds = array<i64: 64, 128>}, {pipeline_mode = #tpu.pipeline_mode<synchronous>, transform_indices = @transform_2, window_bounds = array<i64: 1, 128>}, {pipeline_mode = #tpu.pipeline_mode<synchronous>, transform_indices = @transform_3, window_bounds = array<i64: 1, 64>}, {pipeline_mode = #tpu.pipeline_mode<synchronous>, transform_indices = @transform_4, window_bounds = array<i64: 1, 64>}, {pipeline_mode = #tpu.pipeline_mode<synchronous>, transform_indices = @transform_5, window_bounds = array<i64: 1, 32>}, {pipeline_mode = #tpu.pipeline_mode<synchronous>, transform_indices = @transform_6, window_bounds = array<i64: 1, 32>}, {pipeline_mode = #tpu.pipeline_mode<synchronous>, transform_indices = @transform_7, window_bounds = array<i64: 64, 64>}, {pipeline_mode = #tpu.pipeline_mode<synchronous>, transform_indices = @transform_8, window_bounds = array<i64: 32, 32>}, {pipeline_mode = #tpu.pipeline_mode<synchronous>, transform_indices = @transform_9, window_bounds = array<i64: 64, 64>}, {pipeline_mode = #tpu.pipeline_mode<synchronous>, transform_indices = @transform_10, window_bounds = array<i64: 32, 32>}, {pipeline_mode = #tpu.pipeline_mode<synchronous>, transform_indices = @transform_11, window_bounds = array<i64: 8, 64>}, {pipeline_mode = #tpu.pipeline_mode<synchronous>, transform_indices = @transform_12, window_bounds = array<i64: 8, 64>}, {pipeline_mode = #tpu.pipeline_mode<synchronous>, transform_indices = @transform_13, window_bounds = array<i64: 8, 32>}, {pipeline_mode = #tpu.pipeline_mode<synchronous>, transform_indices = @transform_14, window_bounds = array<i64: 8, 32>}, {pipeline_mode = #tpu.pipeline_mode<synchronous>, transform_indices = @transform_15, window_bounds = array<i64: 8, 8>}, {pipeline_mode = #tpu.pipeline_mode<synchronous>, transform_indices = @transform_16, window_bounds = array<i64: 64, 64>}, {transform_indices = @transform_17, window_bounds = array<i64: 1, 8, 64>}]} {
    %c0 = arith.constant 0 : index
    %c0_0 = arith.constant 0 : index
    %c0_1 = arith.constant 0 : index
    %0 = vector.load %arg1[%c0, %c0_0, %c0_1] : memref<1x8x64xf32, #tpu.memory_space<vmem>>, vector<1x8x64xf32>
    %1 = vector.shape_cast %0 : vector<1x8x64xf32> to vector<8x64xf32>
    %c0_2 = arith.constant 0 : index
    %c0_3 = arith.constant 0 : index
    %2 = vector.load %arg2[%c0_2, %c0_3] : memref<64x128xf32, #tpu.memory_space<vmem>>, vector<64x128xf32>
    %cst = arith.constant dense<0.000000e+00> : vector<8x128xf32>
    %3 = tpu.matmul %1, %2, %cst {dimension_numbers = #tpu.dot_dimension_numbers<[1], [0], [0], [1], [0, 0, 1, 1], [], []>} : vector<8x64xf32>, vector<64x128xf32>, vector<8x128xf32> -> vector<8x128xf32>
    %c0_4 = arith.constant 0 : index
    %c0_5 = arith.constant 0 : index
    %4 = vector.load %arg3[%c0_4, %c0_5] : memref<1x128xf32, #tpu.memory_space<vmem>>, vector<1x128xf32>
    %5 = vector.broadcast %4 : vector<1x128xf32> to vector<8x128xf32>
    %6 = arith.addf %3, %5 : vector<8x128xf32>
    %7 = vector.extract_strided_slice %6 {offsets = [0, 0], sizes = [8, 64], strides = [1, 1]} : vector<8x128xf32> to vector<8x64xf32>
    %8 = vector.extract_strided_slice %6 {offsets = [0, 64], sizes = [8, 32], strides = [1, 1]} : vector<8x128xf32> to vector<8x32xf32>
    %9 = vector.extract_strided_slice %6 {offsets = [0, 96], sizes = [8, 32], strides = [1, 1]} : vector<8x128xf32> to vector<8x32xf32>
    %c0_6 = arith.constant 0 : index
    %c0_7 = arith.constant 0 : index
    %10 = vector.load %arg8[%c0_6, %c0_7] : memref<64x64xf32, #tpu.memory_space<vmem>>, vector<64x64xf32>
    %cst_8 = arith.constant dense<0.000000e+00> : vector<8x64xf32>
    %11 = tpu.matmul %7, %10, %cst_8 {dimension_numbers = #tpu.dot_dimension_numbers<[1], [0], [0], [1], [0, 0, 1, 1], [], []>} : vector<8x64xf32>, vector<64x64xf32>, vector<8x64xf32> -> vector<8x64xf32>
    %12 = arith.subf %7, %11 : vector<8x64xf32>
    %13 = arith.mulf %12, %12 : vector<8x64xf32>
    %c0_9 = arith.constant 0 : index
    %c0_10 = arith.constant 0 : index
    %14 = vector.load %arg8[%c0_9, %c0_10] : memref<64x64xf32, #tpu.memory_space<vmem>>, vector<64x64xf32>
    %cst_11 = arith.constant dense<0.000000e+00> : vector<8x64xf32>
    %15 = tpu.matmul %13, %14, %cst_11 {dimension_numbers = #tpu.dot_dimension_numbers<[1], [0], [0], [1], [0, 0, 1, 1], [], []>} : vector<8x64xf32>, vector<64x64xf32>, vector<8x64xf32> -> vector<8x64xf32>
    %cst_12 = arith.constant 9.99999974E-6 : f32
    %16 = vector.broadcast %cst_12 : f32 to vector<8x64xf32>
    %17 = arith.addf %15, %16 : vector<8x64xf32>
    %18 = math.rsqrt %17 : vector<8x64xf32>
    %19 = arith.mulf %12, %18 : vector<8x64xf32>
    %c0_13 = arith.constant 0 : index
    %c0_14 = arith.constant 0 : index
    %20 = vector.load %arg4[%c0_13, %c0_14] : memref<1x64xf32, #tpu.memory_space<vmem>>, vector<1x64xf32>
    %21 = vector.broadcast %20 : vector<1x64xf32> to vector<8x64xf32>
    %22 = arith.mulf %19, %21 : vector<8x64xf32>
    %c0_15 = arith.constant 0 : index
    %c0_16 = arith.constant 0 : index
    %23 = vector.load %arg5[%c0_15, %c0_16] : memref<1x64xf32, #tpu.memory_space<vmem>>, vector<1x64xf32>
    %24 = vector.broadcast %23 : vector<1x64xf32> to vector<8x64xf32>
    %25 = arith.addf %22, %24 : vector<8x64xf32>
    %c0_17 = arith.constant 0 : index
    %c0_18 = arith.constant 0 : index
    %26 = vector.load %arg9[%c0_17, %c0_18] : memref<32x32xf32, #tpu.memory_space<vmem>>, vector<32x32xf32>
    %cst_19 = arith.constant dense<0.000000e+00> : vector<8x32xf32>
    %27 = tpu.matmul %8, %26, %cst_19 {dimension_numbers = #tpu.dot_dimension_numbers<[1], [0], [0], [1], [0, 0, 1, 1], [], []>} : vector<8x32xf32>, vector<32x32xf32>, vector<8x32xf32> -> vector<8x32xf32>
    %28 = arith.subf %8, %27 : vector<8x32xf32>
    %29 = arith.mulf %28, %28 : vector<8x32xf32>
    %c0_20 = arith.constant 0 : index
    %c0_21 = arith.constant 0 : index
    %30 = vector.load %arg9[%c0_20, %c0_21] : memref<32x32xf32, #tpu.memory_space<vmem>>, vector<32x32xf32>
    %cst_22 = arith.constant dense<0.000000e+00> : vector<8x32xf32>
    %31 = tpu.matmul %29, %30, %cst_22 {dimension_numbers = #tpu.dot_dimension_numbers<[1], [0], [0], [1], [0, 0, 1, 1], [], []>} : vector<8x32xf32>, vector<32x32xf32>, vector<8x32xf32> -> vector<8x32xf32>
    %cst_23 = arith.constant 9.99999974E-6 : f32
    %32 = vector.broadcast %cst_23 : f32 to vector<8x32xf32>
    %33 = arith.addf %31, %32 : vector<8x32xf32>
    %34 = math.rsqrt %33 : vector<8x32xf32>
    %35 = arith.mulf %28, %34 : vector<8x32xf32>
    %c0_24 = arith.constant 0 : index
    %c0_25 = arith.constant 0 : index
    %36 = vector.load %arg6[%c0_24, %c0_25] : memref<1x32xf32, #tpu.memory_space<vmem>>, vector<1x32xf32>
    %37 = vector.broadcast %36 : vector<1x32xf32> to vector<8x32xf32>
    %38 = arith.mulf %35, %37 : vector<8x32xf32>
    %c0_26 = arith.constant 0 : index
    %c0_27 = arith.constant 0 : index
    %39 = vector.load %arg7[%c0_26, %c0_27] : memref<1x32xf32, #tpu.memory_space<vmem>>, vector<1x32xf32>
    %40 = vector.broadcast %39 : vector<1x32xf32> to vector<8x32xf32>
    %41 = arith.addf %38, %40 : vector<8x32xf32>
    %c0_28 = arith.constant 0 : index
    %c0_29 = arith.constant 0 : index
    %42 = vector.load %arg12[%c0_28, %c0_29] : memref<8x64xf32, #tpu.memory_space<vmem>>, vector<8x64xf32>
    %43 = arith.mulf %25, %42 : vector<8x64xf32>
    %c0_30 = arith.constant 0 : index
    %c0_31 = arith.constant 0 : index
    %44 = vector.load %arg10[%c0_30, %c0_31] : memref<64x64xf32, #tpu.memory_space<vmem>>, vector<64x64xf32>
    %cst_32 = arith.constant dense<0.000000e+00> : vector<8x64xf32>
    %45 = tpu.matmul %25, %44, %cst_32 {dimension_numbers = #tpu.dot_dimension_numbers<[1], [0], [0], [1], [0, 0, 1, 1], [], []>} : vector<8x64xf32>, vector<64x64xf32>, vector<8x64xf32> -> vector<8x64xf32>
    %c0_33 = arith.constant 0 : index
    %c0_34 = arith.constant 0 : index
    %46 = vector.load %arg13[%c0_33, %c0_34] : memref<8x64xf32, #tpu.memory_space<vmem>>, vector<8x64xf32>
    %47 = arith.mulf %45, %46 : vector<8x64xf32>
    %48 = arith.addf %43, %47 : vector<8x64xf32>
    %c0_35 = arith.constant 0 : index
    %c0_36 = arith.constant 0 : index
    %49 = vector.load %arg14[%c0_35, %c0_36] : memref<8x32xf32, #tpu.memory_space<vmem>>, vector<8x32xf32>
    %50 = arith.mulf %41, %49 : vector<8x32xf32>
    %c0_37 = arith.constant 0 : index
    %c0_38 = arith.constant 0 : index
    %51 = vector.load %arg11[%c0_37, %c0_38] : memref<32x32xf32, #tpu.memory_space<vmem>>, vector<32x32xf32>
    %cst_39 = arith.constant dense<0.000000e+00> : vector<8x32xf32>
    %52 = tpu.matmul %41, %51, %cst_39 {dimension_numbers = #tpu.dot_dimension_numbers<[1], [0], [0], [1], [0, 0, 1, 1], [], []>} : vector<8x32xf32>, vector<32x32xf32>, vector<8x32xf32> -> vector<8x32xf32>
    %c0_40 = arith.constant 0 : index
    %c0_41 = arith.constant 0 : index
    %53 = vector.load %arg15[%c0_40, %c0_41] : memref<8x32xf32, #tpu.memory_space<vmem>>, vector<8x32xf32>
    %54 = arith.mulf %52, %53 : vector<8x32xf32>
    %55 = arith.addf %50, %54 : vector<8x32xf32>
    %c0_42 = arith.constant 0 : index
    %c0_43 = arith.constant 0 : index
    %56 = vector.load %arg16[%c0_42, %c0_43] : memref<8x8xf32, #tpu.memory_space<vmem>>, vector<8x8xf32>
    %57 = vector.extract_strided_slice %48 {offsets = [0, 0], sizes = [8, 16], strides = [1, 1]} : vector<8x64xf32> to vector<8x16xf32>
    %58 = vector.extract_strided_slice %55 {offsets = [0, 0], sizes = [8, 16], strides = [1, 1]} : vector<8x32xf32> to vector<8x16xf32>
    %59 = vector.extract_strided_slice %9 {offsets = [0, 0], sizes = [8, 16], strides = [1, 1]} : vector<8x32xf32> to vector<8x16xf32>
    %60 = tpu.transpose %58, [1, 0] : vector<8x16xf32> -> vector<16x8xf32>
    %cst_44 = arith.constant dense<0.000000e+00> : vector<8x8xf32>
    %61 = tpu.matmul %57, %60, %cst_44 {dimension_numbers = #tpu.dot_dimension_numbers<[1], [0], [0], [1], [0, 0, 1, 1], [], []>} : vector<8x16xf32>, vector<16x8xf32>, vector<8x8xf32> -> vector<8x8xf32>
    %62 = arith.addf %61, %56 : vector<8x8xf32>
    %cst_45 = arith.constant dense<0xFF800000> : vector<8xf32>
    %63 = vector.multi_reduction <maximumf>, %62, %cst_45 [1] : vector<8x8xf32> to vector<8xf32>
    %64 = vector.shape_cast %63 : vector<8xf32> to vector<8x1xf32>
    %65 = vector.broadcast %64 : vector<8x1xf32> to vector<8x8xf32>
    %66 = arith.subf %62, %65 : vector<8x8xf32>
    %67 = math.exp %66 : vector<8x8xf32>
    %cst_46 = arith.constant dense<0.000000e+00> : vector<8xf32>
    %68 = vector.multi_reduction <add>, %67, %cst_46 [1] : vector<8x8xf32> to vector<8xf32>
    %69 = vector.shape_cast %68 : vector<8xf32> to vector<8x1xf32>
    %70 = tpu.reciprocal %69 : vector<8x1xf32> -> vector<8x1xf32>
    %cst_47 = arith.constant dense<0.000000e+00> : vector<8x16xf32>
    %71 = tpu.matmul %67, %59, %cst_47 {dimension_numbers = #tpu.dot_dimension_numbers<[1], [0], [0], [1], [0, 0, 1, 1], [], []>} : vector<8x8xf32>, vector<8x16xf32>, vector<8x16xf32> -> vector<8x16xf32>
    %72 = vector.broadcast %70 : vector<8x1xf32> to vector<8x16xf32>
    %73 = arith.mulf %71, %72 : vector<8x16xf32>
    %74 = vector.extract_strided_slice %48 {offsets = [0, 16], sizes = [8, 16], strides = [1, 1]} : vector<8x64xf32> to vector<8x16xf32>
    %75 = vector.extract_strided_slice %55 {offsets = [0, 0], sizes = [8, 16], strides = [1, 1]} : vector<8x32xf32> to vector<8x16xf32>
    %76 = vector.extract_strided_slice %9 {offsets = [0, 0], sizes = [8, 16], strides = [1, 1]} : vector<8x32xf32> to vector<8x16xf32>
    %77 = tpu.transpose %75, [1, 0] : vector<8x16xf32> -> vector<16x8xf32>
    %cst_48 = arith.constant dense<0.000000e+00> : vector<8x8xf32>
    %78 = tpu.matmul %74, %77, %cst_48 {dimension_numbers = #tpu.dot_dimension_numbers<[1], [0], [0], [1], [0, 0, 1, 1], [], []>} : vector<8x16xf32>, vector<16x8xf32>, vector<8x8xf32> -> vector<8x8xf32>
    %79 = arith.addf %78, %56 : vector<8x8xf32>
    %cst_49 = arith.constant dense<0xFF800000> : vector<8xf32>
    %80 = vector.multi_reduction <maximumf>, %79, %cst_49 [1] : vector<8x8xf32> to vector<8xf32>
    %81 = vector.shape_cast %80 : vector<8xf32> to vector<8x1xf32>
    %82 = vector.broadcast %81 : vector<8x1xf32> to vector<8x8xf32>
    %83 = arith.subf %79, %82 : vector<8x8xf32>
    %84 = math.exp %83 : vector<8x8xf32>
    %cst_50 = arith.constant dense<0.000000e+00> : vector<8xf32>
    %85 = vector.multi_reduction <add>, %84, %cst_50 [1] : vector<8x8xf32> to vector<8xf32>
    %86 = vector.shape_cast %85 : vector<8xf32> to vector<8x1xf32>
    %87 = tpu.reciprocal %86 : vector<8x1xf32> -> vector<8x1xf32>
    %cst_51 = arith.constant dense<0.000000e+00> : vector<8x16xf32>
    %88 = tpu.matmul %84, %76, %cst_51 {dimension_numbers = #tpu.dot_dimension_numbers<[1], [0], [0], [1], [0, 0, 1, 1], [], []>} : vector<8x8xf32>, vector<8x16xf32>, vector<8x16xf32> -> vector<8x16xf32>
    %89 = vector.broadcast %87 : vector<8x1xf32> to vector<8x16xf32>
    %90 = arith.mulf %88, %89 : vector<8x16xf32>
    %91 = vector.extract_strided_slice %48 {offsets = [0, 32], sizes = [8, 16], strides = [1, 1]} : vector<8x64xf32> to vector<8x16xf32>
    %92 = vector.extract_strided_slice %55 {offsets = [0, 16], sizes = [8, 16], strides = [1, 1]} : vector<8x32xf32> to vector<8x16xf32>
    %93 = vector.extract_strided_slice %9 {offsets = [0, 16], sizes = [8, 16], strides = [1, 1]} : vector<8x32xf32> to vector<8x16xf32>
    %94 = tpu.transpose %92, [1, 0] : vector<8x16xf32> -> vector<16x8xf32>
    %cst_52 = arith.constant dense<0.000000e+00> : vector<8x8xf32>
    %95 = tpu.matmul %91, %94, %cst_52 {dimension_numbers = #tpu.dot_dimension_numbers<[1], [0], [0], [1], [0, 0, 1, 1], [], []>} : vector<8x16xf32>, vector<16x8xf32>, vector<8x8xf32> -> vector<8x8xf32>
    %96 = arith.addf %95, %56 : vector<8x8xf32>
    %cst_53 = arith.constant dense<0xFF800000> : vector<8xf32>
    %97 = vector.multi_reduction <maximumf>, %96, %cst_53 [1] : vector<8x8xf32> to vector<8xf32>
    %98 = vector.shape_cast %97 : vector<8xf32> to vector<8x1xf32>
    %99 = vector.broadcast %98 : vector<8x1xf32> to vector<8x8xf32>
    %100 = arith.subf %96, %99 : vector<8x8xf32>
    %101 = math.exp %100 : vector<8x8xf32>
    %cst_54 = arith.constant dense<0.000000e+00> : vector<8xf32>
    %102 = vector.multi_reduction <add>, %101, %cst_54 [1] : vector<8x8xf32> to vector<8xf32>
    %103 = vector.shape_cast %102 : vector<8xf32> to vector<8x1xf32>
    %104 = tpu.reciprocal %103 : vector<8x1xf32> -> vector<8x1xf32>
    %cst_55 = arith.constant dense<0.000000e+00> : vector<8x16xf32>
    %105 = tpu.matmul %101, %93, %cst_55 {dimension_numbers = #tpu.dot_dimension_numbers<[1], [0], [0], [1], [0, 0, 1, 1], [], []>} : vector<8x8xf32>, vector<8x16xf32>, vector<8x16xf32> -> vector<8x16xf32>
    %106 = vector.broadcast %104 : vector<8x1xf32> to vector<8x16xf32>
    %107 = arith.mulf %105, %106 : vector<8x16xf32>
    %108 = vector.extract_strided_slice %48 {offsets = [0, 48], sizes = [8, 16], strides = [1, 1]} : vector<8x64xf32> to vector<8x16xf32>
    %109 = vector.extract_strided_slice %55 {offsets = [0, 16], sizes = [8, 16], strides = [1, 1]} : vector<8x32xf32> to vector<8x16xf32>
    %110 = vector.extract_strided_slice %9 {offsets = [0, 16], sizes = [8, 16], strides = [1, 1]} : vector<8x32xf32> to vector<8x16xf32>
    %111 = tpu.transpose %109, [1, 0] : vector<8x16xf32> -> vector<16x8xf32>
    %cst_56 = arith.constant dense<0.000000e+00> : vector<8x8xf32>
    %112 = tpu.matmul %108, %111, %cst_56 {dimension_numbers = #tpu.dot_dimension_numbers<[1], [0], [0], [1], [0, 0, 1, 1], [], []>} : vector<8x16xf32>, vector<16x8xf32>, vector<8x8xf32> -> vector<8x8xf32>
    %113 = arith.addf %112, %56 : vector<8x8xf32>
    %cst_57 = arith.constant dense<0xFF800000> : vector<8xf32>
    %114 = vector.multi_reduction <maximumf>, %113, %cst_57 [1] : vector<8x8xf32> to vector<8xf32>
    %115 = vector.shape_cast %114 : vector<8xf32> to vector<8x1xf32>
    %116 = vector.broadcast %115 : vector<8x1xf32> to vector<8x8xf32>
    %117 = arith.subf %113, %116 : vector<8x8xf32>
    %118 = math.exp %117 : vector<8x8xf32>
    %cst_58 = arith.constant dense<0.000000e+00> : vector<8xf32>
    %119 = vector.multi_reduction <add>, %118, %cst_58 [1] : vector<8x8xf32> to vector<8xf32>
    %120 = vector.shape_cast %119 : vector<8xf32> to vector<8x1xf32>
    %121 = tpu.reciprocal %120 : vector<8x1xf32> -> vector<8x1xf32>
    %cst_59 = arith.constant dense<0.000000e+00> : vector<8x16xf32>
    %122 = tpu.matmul %118, %110, %cst_59 {dimension_numbers = #tpu.dot_dimension_numbers<[1], [0], [0], [1], [0, 0, 1, 1], [], []>} : vector<8x8xf32>, vector<8x16xf32>, vector<8x16xf32> -> vector<8x16xf32>
    %123 = vector.broadcast %121 : vector<8x1xf32> to vector<8x16xf32>
    %124 = arith.mulf %122, %123 : vector<8x16xf32>
    %125 = tpu.concatenate %73, %90, %107, %124 in 1 : vector<8x16xf32>, vector<8x16xf32>, vector<8x16xf32>, vector<8x16xf32> -> vector<8x64xf32>
    %c0_60 = arith.constant 0 : index
    %c0_61 = arith.constant 0 : index
    %126 = vector.load %arg17[%c0_60, %c0_61] : memref<64x64xf32, #tpu.memory_space<vmem>>, vector<64x64xf32>
    %cst_62 = arith.constant dense<0.000000e+00> : vector<8x64xf32>
    %127 = tpu.matmul %125, %126, %cst_62 {dimension_numbers = #tpu.dot_dimension_numbers<[1], [0], [0], [1], [0, 0, 1, 1], [], []>} : vector<8x64xf32>, vector<64x64xf32>, vector<8x64xf32> -> vector<8x64xf32>
    %c0_63 = arith.constant 0 : index
    %c0_64 = arith.constant 0 : index
    %c0_65 = arith.constant 0 : index
    %128 = vector.load %arg18[%c0_63, %c0_64, %c0_65] : memref<1x8x64xf32, #tpu.memory_space<vmem>>, vector<1x8x64xf32>
    %129 = vector.shape_cast %128 : vector<1x8x64xf32> to vector<8x64xf32>
    %130 = vector.shape_cast %127 : vector<8x64xf32> to vector<1x8x64xf32>
    tpu.vector_store %arg18[%c0_63, %c0_64, %c0_65], %130 {strides = array<i32>} : memref<1x8x64xf32, #tpu.memory_space<vmem>>, vector<1x8x64xf32>,
    return
  }
  func.func @transform_0(%arg0: i32) -> (i32, i32, i32) {
    %c0_i32 = arith.constant 0 : i32
    %c0_i32_0 = arith.constant 0 : i32
    %c0_i32_1 = arith.constant 0 : i32
    return %arg0, %c0_i32, %c0_i32_0 : i32, i32, i32
  }
  func.func @transform_1(%arg0: i32) -> (i32, i32) {
    %c0_i32 = arith.constant 0 : i32
    %c0_i32_0 = arith.constant 0 : i32
    %c0_i32_1 = arith.constant 0 : i32
    return %c0_i32, %c0_i32_0 : i32, i32
  }
  func.func @transform_2(%arg0: i32) -> (i32, i32) {
    %c0_i32 = arith.constant 0 : i32
    %c0_i32_0 = arith.constant 0 : i32
    %c0_i32_1 = arith.constant 0 : i32
    return %c0_i32, %c0_i32_0 : i32, i32
  }
  func.func @transform_3(%arg0: i32) -> (i32, i32) {
    %c0_i32 = arith.constant 0 : i32
    %c0_i32_0 = arith.constant 0 : i32
    %c0_i32_1 = arith.constant 0 : i32
    return %c0_i32, %c0_i32_0 : i32, i32
  }
  func.func @transform_4(%arg0: i32) -> (i32, i32) {
    %c0_i32 = arith.constant 0 : i32
    %c0_i32_0 = arith.constant 0 : i32
    %c0_i32_1 = arith.constant 0 : i32
    return %c0_i32, %c0_i32_0 : i32, i32
  }
  func.func @transform_5(%arg0: i32) -> (i32, i32) {
    %c0_i32 = arith.constant 0 : i32
    %c0_i32_0 = arith.constant 0 : i32
    %c0_i32_1 = arith.constant 0 : i32
    return %c0_i32, %c0_i32_0 : i32, i32
  }
  func.func @transform_6(%arg0: i32) -> (i32, i32) {
    %c0_i32 = arith.constant 0 : i32
    %c0_i32_0 = arith.constant 0 : i32
    %c0_i32_1 = arith.constant 0 : i32
    return %c0_i32, %c0_i32_0 : i32, i32
  }
  func.func @transform_7(%arg0: i32) -> (i32, i32) {
    %c0_i32 = arith.constant 0 : i32
    %c0_i32_0 = arith.constant 0 : i32
    %c0_i32_1 = arith.constant 0 : i32
    return %c0_i32, %c0_i32_0 : i32, i32
  }
  func.func @transform_8(%arg0: i32) -> (i32, i32) {
    %c0_i32 = arith.constant 0 : i32
    %c0_i32_0 = arith.constant 0 : i32
    %c0_i32_1 = arith.constant 0 : i32
    return %c0_i32, %c0_i32_0 : i32, i32
  }
  func.func @transform_9(%arg0: i32) -> (i32, i32) {
    %c0_i32 = arith.constant 0 : i32
    %c0_i32_0 = arith.constant 0 : i32
    %c0_i32_1 = arith.constant 0 : i32
    return %c0_i32, %c0_i32_0 : i32, i32
  }
  func.func @transform_10(%arg0: i32) -> (i32, i32) {
    %c0_i32 = arith.constant 0 : i32
    %c0_i32_0 = arith.constant 0 : i32
    %c0_i32_1 = arith.constant 0 : i32
    return %c0_i32, %c0_i32_0 : i32, i32
  }
  func.func @transform_11(%arg0: i32) -> (i32, i32) {
    %c0_i32 = arith.constant 0 : i32
    %c0_i32_0 = arith.constant 0 : i32
    %c0_i32_1 = arith.constant 0 : i32
    return %c0_i32, %c0_i32_0 : i32, i32
  }
  func.func @transform_12(%arg0: i32) -> (i32, i32) {
    %c0_i32 = arith.constant 0 : i32
    %c0_i32_0 = arith.constant 0 : i32
    %c0_i32_1 = arith.constant 0 : i32
    return %c0_i32, %c0_i32_0 : i32, i32
  }
  func.func @transform_13(%arg0: i32) -> (i32, i32) {
    %c0_i32 = arith.constant 0 : i32
    %c0_i32_0 = arith.constant 0 : i32
    %c0_i32_1 = arith.constant 0 : i32
    return %c0_i32, %c0_i32_0 : i32, i32
  }
  func.func @transform_14(%arg0: i32) -> (i32, i32) {
    %c0_i32 = arith.constant 0 : i32
    %c0_i32_0 = arith.constant 0 : i32
    %c0_i32_1 = arith.constant 0 : i32
    return %c0_i32, %c0_i32_0 : i32, i32
  }
  func.func @transform_15(%arg0: i32) -> (i32, i32) {
    %c0_i32 = arith.constant 0 : i32
    %c0_i32_0 = arith.constant 0 : i32
    %c0_i32_1 = arith.constant 0 : i32
    return %c0_i32, %c0_i32_0 : i32, i32
  }
  func.func @transform_16(%arg0: i32) -> (i32, i32) {
    %c0_i32 = arith.constant 0 : i32
    %c0_i32_0 = arith.constant 0 : i32
    %c0_i32_1 = arith.constant 0 : i32
    return %c0_i32, %c0_i32_0 : i32, i32
  }
  func.func @transform_17(%arg0: i32) -> (i32, i32, i32) {
    %c0_i32 = arith.constant 0 : i32
    %c0_i32_0 = arith.constant 0 : i32
    %c0_i32_1 = arith.constant 0 : i32
    return %arg0, %c0_i32, %c0_i32_0 : i32, i32, i32
  }
}

</mosaic_0001>

<bundles_post_ra>
// kernel: tpu_custom_call.1
= control target key start
LH: loop header
LB: loop body
LE: loop exit
PB: predicated region body
PF: predicated region fallthrough
CT: control target
= control target key end

     0   :  { %s3891_s0 = inlined_call_operand.hbm [shape: f32[2,8,64], index: 0, kind: input, shape index: {}]   ;;  %s3892_s1 = inlined_call_operand.hbm [shape: f32[64,128], index: 1, kind: input, shape index: {}]   ;;  %s3893_s2 = inlined_call_operand.hbm [shape: f32[1,128], index: 2, kind: input, shape index: {}]   ;;  %s3894_s3 = inlined_call_operand.hbm [shape: f32[1,64], index: 3, kind: input, shape index: {}]   ;;  %s3895_s4 = inlined_call_operand.hbm [shape: f32[1,64], index: 4, kind: input, shape index: {}]   ;;  %s3896_s5 = inlined_call_operand.hbm [shape: f32[1,32], index: 5, kind: input, shape index: {}]   ;;  %s3897_s6 = inlined_call_operand.hbm [shape: f32[1,32], index: 6, kind: input, shape index: {}]   ;;  %s3898_s7 = inlined_call_operand.hbm [shape: f32[64,64], index: 7, kind: input, shape index: {}]   ;;  %s3899_s8 = inlined_call_operand.hbm [shape: f32[32,32], index: 8, kind: input, shape index: {}]   ;;  %s3900_s9 = inlined_call_operand.hbm [shape: f32[64,64], index: 9, kind: input, shape index: {}]   ;;  %s3901_s10 = inlined_call_operand.hbm [shape: f32[32,32], index: 10, kind: input, shape index: {}]   ;;  %s3902_s11 = inlined_call_operand.vmem [shape: f32[8,64], index: 11, kind: input, shape index: {}]   ;;  %s3903_s12 = inlined_call_operand.vmem [shape: f32[8,64], index: 12, kind: input, shape index: {}]   ;;  %s3904_s13 = inlined_call_operand.hbm [shape: f32[8,32], index: 13, kind: input, shape index: {}]   ;;  %s3905_s14 = inlined_call_operand.vmem [shape: f32[8,32], index: 14, kind: input, shape index: {}]   ;;  %s3906_s15 = inlined_call_operand.hbm [shape: f32[8,8], index: 15, kind: input, shape index: {}]   ;;  %s3907_s16 = inlined_call_operand.hbm [shape: f32[64,64], index: 16, kind: input, shape index: {}]   ;;  %s3908_s17 = inlined_call_operand.hbm [shape: f32[2,8,64], index: 17, kind: output, shape index: {}]  }
   0x1   :  { %3916 = sst [smem:[#allocation36_spill]] %s3891_s0 }
   0x2   :  { %3917 = sst [smem:[#allocation37_spill]] %s3892_s1 }
   0x3   :  { %3918 = sst [smem:[#allocation38_spill]] %s3893_s2 }
   0x4   :  { %3919 = sst [smem:[#allocation39_spill]] %s3894_s3 }
   0x5   :  { %3920 = sst [smem:[#allocation40_spill]] %s3895_s4 }
   0x6   :  { %3921 = sst [smem:[#allocation41_spill]] %s3896_s5 }
   0x7   :  { %3922 = sst [smem:[#allocation42_spill]] %s3897_s6 }
   0x8   :  { %3923 = sst [smem:[#allocation43_spill]] %s3898_s7 }
   0x9   :  { %3924 = sst [smem:[#allocation44_spill]] %s3902_s11 }
   0xa   :  { %3925 = sst [smem:[#allocation45_spill]] %s3903_s12 }
   0xb   :  { %3926 = sst [smem:[#allocation46_spill]] %s3905_s14 }
   0xc   :  { %3927 = sst [smem:[#allocation47_spill]] %s3908_s17 }
   0xd   :  { %22 = vsyncpa [#allocation3], 0 }
   0xe   :  { %24 = vsyncpa [#allocation3 + $0x1], 0 }
   0xf   :  { %25 = vsyncpa [#allocation6], 0 }
  0x10   :  { %26 = vsyncpa [#allocation9], 0 }
  0x11   :  { %27 = vsyncpa [#allocation12], 0 }
  0x12   :  { %28 = vsyncpa [#allocation15], 0 }
  0x13   :  { %29 = vsyncpa [#allocation18], 0 }
  0x14   :  { %30 = vsyncpa [#allocation21], 0 }
  0x15   :  { %31 = vsyncpa [#allocation24], 0 }
  0x16   :  { %32 = vsyncpa [#allocation4], 0 }
  0x17   :  { %34 = vsyncpa [#allocation4 + $0x1], 0  ;;  %s3413_s24 = smov 0   ;;  %s3415_s25 = smov 0  }
  0x18   :  { %s3417_s26 = smov 0   ;;  %s3419_s27 = smov 0  }
  0x19 LB: > { %s3297_s28 = smov [#allocation5]   ;;  %s3434_s0 = sadd.s32 4294967295, %s3295_s27   ;;  %s3295_s27 = sphi %s3419_s27, %s3972_s27   ;;  %s3291_s26 = sphi %s3417_s26, %s3971_s26   ;;  %s3287_s25 = sphi %s3415_s25, %s3970_s25   ;;  %s3283_s24 = sphi %s3413_s24, %s3969_s24  }
  0x1a   : > { %s445_s29 = sshll.u32 %s3297_s28, 4  ;;  %p2323_p0 = scmp.ge.s32.totalorder %s3295_s27, 1  ;;  %s446_s29 = int_to_ptr.vmem [resolvable:$true] %s445_s29 }
  0x1b   : > { %p3912_p1 = scmp.eq.s32.totalorder %s3434_s0, 0  ;;  %p433_p2 = scmp.lt.s32.totalorder %s3295_s27, 3 }
  0x1c   : > { %s3298_s18 = smov [#allocation8]   ;;  %s3299_s20 = smov [#allocation11]  }
  0x1d   : > { %p3439_p3 = pnand %p2323_p0, %p433_p2  ;;  %s470_s19 = sshll.u32 %s3298_s18, 4  ;;  %s471_s19 = int_to_ptr.vmem [resolvable:$true] %s470_s19 }
  0x1e   : > { %s492_s21 = sshll.u32 %s3299_s20, 4  ;;  %s2848_s23 = scalar_lea.vmem %s446_s29, 1024  ;;  %s3452_s21 = int_to_ptr.vmem [resolvable:$true] %s492_s21 }
  0x1f   : > { %s3928_s30 = scalar_select %p3439_p3, 1, 0 }
  0x20   : > { %p2685_p5 = pneg %p3439_p3  ;;  %p2849_p8 = scmp.ne.s32.totalorder %s446_s29, %s2848_s23 }
  0x21   : > { %3929 = sst [smem:[#allocation35_spill]] %s3928_s30  ;;  %p2856_p11 = scmp.lt.s32.totalorder %s446_s29, %s446_s29 }
  0x22   : > { %p3448_p6 = pnand %p2685_p5, %p3912_p1  ;;  %p2857_p12 = scmp.lt.s32.totalorder %s2848_s23, %s2848_s23 }
  0x24   : > { %p3456_p7 = pneg %p3448_p6  ;;  %p2858_p13 = por %p2857_p12, %p2856_p11 }
  0x26   : > { %p2851_p9 = pnand %p2849_p8, %p3456_p7 }
  0x28   : > { %p2852_p10 = pneg %p2851_p9 }
  0x2a   : > { %p2859_p0 = pnand %p2858_p13, %p2852_p10 }
  0x2c   : > { %2862 = shalt.err (!%p2859_p0)
}
  0x2d   : > { %s3300_s28 = smov 128   ;;  %s3301_s18 = smov 8  }
  0x2e   : > { %s3932_s14 = sld [smem:[#allocation37_spill]]  ;;  %s2874_s12 = scalar_lea.vmem %s471_s19, 16 }
  0x2f   : > { %p2875_p2 = scmp.ne.s32.totalorder %s471_s19, %s2874_s12  ;;  %s2881_s23 = scalar_lea.vmem %s471_s19, 32 }
  0x30   : > { %p2882_p9 = scmp.lt.s32.totalorder %s471_s19, %s471_s19  ;;  %p2883_p10 = scmp.lt.s32.totalorder %s2881_s23, %s2874_s12 }
  0x31   : > { %p2877_p5 = pnand %p2875_p2, %p3456_p7 }
  0x32   : > { %p2884_p11 = por %p2883_p10, %p2882_p9 }
  0x33   : > { %p2878_p8 = pneg %p2877_p5 }
  0x34   : > { %2688 = dma.hbm_to_vmem [thread:$0]  (!%p3448_p6), %s3932_s14, 1024, %s446_s29, [#allocation6], %s3300_s28, %s3300_s28, %s3301_s18  }
  0x35   : > { %p2885_p12 = pnand %p2884_p11, %p2878_p8 }
  0x37   : > { %2888 = shalt.err (!%p2885_p12)
}
  0x38   : > { %s3933_s3 = sld [smem:[#allocation39_spill]]  ;;  %s2900_s14 = scalar_lea.vmem %s3452_s21, 16 }
  0x39   : > { %p2901_p13 = scmp.ne.s32.totalorder %s3452_s21, %s2900_s14  ;;  %s2907_s12 = scalar_lea.vmem %s3452_s21, 32 }
  0x3a   : > { %p2908_p5 = scmp.lt.s32.totalorder %s3452_s21, %s3452_s21  ;;  %p2909_p8 = scmp.lt.s32.totalorder %s2907_s12, %s2900_s14 }
  0x3b   : > { %p2903_p0 = pnand %p2901_p13, %p3456_p7 }
  0x3c   : > { %p2910_p9 = por %p2909_p8, %p2908_p5 }
  0x3d   : > { %p2904_p2 = pneg %p2903_p0 }
  0x3e   : > { %2694 = dma.hbm_to_vmem [thread:$0]  (!%p3448_p6), %s3933_s3, 16, %s471_s19, [#allocation9]  }
  0x3f   : > { %p2911_p10 = pnand %p2910_p9, %p2904_p2 }
  0x41   : > { %2914 = shalt.err (!%p2911_p10)
}
  0x42   : > { %s3934_s5 = sld [smem:[#allocation41_spill]]  ;;  %s3302_s29 = smov [#allocation14]  }
  0x43   : > { %s513_s30 = sshll.u32 %s3302_s29, 4  ;;  %s3303_s19 = smov [#allocation17]   ;;  %s514_s30 = int_to_ptr.vmem [resolvable:$true] %s513_s30 }
  0x44   : > { %s539_s20 = sshll.u32 %s3303_s19, 4  ;;  %s2926_s23 = scalar_lea.vmem %s514_s30, 1024  ;;  %s540_s20 = int_to_ptr.vmem [resolvable:$true] %s539_s20 }
  0x45   : > { %p2927_p11 = scmp.ne.s32.totalorder %s514_s30, %s2926_s23  ;;  %p2934_p0 = scmp.lt.s32.totalorder %s514_s30, %s514_s30 }
  0x46   : > { %p2935_p2 = scmp.lt.s32.totalorder %s2926_s23, %s2926_s23 }
  0x47   : > { %p2929_p12 = pnand %p2927_p11, %p3456_p7 }
  0x48   : > { %2700 = dma.hbm_to_vmem [thread:$0]  (!%p3448_p6), %s3934_s5, 16, %s3452_s21, [#allocation12]  }
  0x49   : > { %p2930_p13 = pneg %p2929_p12  ;;  %p2936_p5 = por %p2935_p2, %p2934_p0 }
  0x4b   : > { %p2937_p8 = pnand %p2936_p5, %p2930_p13 }
  0x4d   : > { %2940 = shalt.err (!%p2937_p8)
}
  0x4e   : > { %s3935_s7 = sld [smem:[#allocation43_spill]]  ;;  %s2952_s12 = scalar_lea.vmem %s540_s20, 1024 }
  0x4f   : > { %p2953_p9 = scmp.ne.s32.totalorder %s540_s20, %s2952_s12  ;;  %p2960_p12 = scmp.lt.s32.totalorder %s540_s20, %s540_s20 }
  0x50   : > { %p2961_p0 = scmp.lt.s32.totalorder %s2952_s12, %s2952_s12 }
  0x51   : > { %p2955_p10 = pnand %p2953_p9, %p3456_p7 }
  0x52   : > { %p2962_p13 = por %p2961_p0, %p2960_p12 }
  0x53   : > { %p2956_p11 = pneg %p2955_p10 }
  0x54   : > { %2706 = dma.hbm_to_vmem [thread:$0]  (!%p3448_p6), %s3935_s7, 1024, %s514_s30, [#allocation15], %s3300_s28, %s3300_s28, %s3301_s18  }
  0x55   : > { %p2963_p2 = pnand %p2962_p13, %p2956_p11 }
  0x57   : > { %2966 = shalt.err (!%p2963_p2)
}
  0x58   : > { %2712 = dma.hbm_to_vmem [thread:$0]  (!%p3448_p6), %s3900_s9, 1024, %s540_s20, [#allocation18], %s3300_s28, %s3300_s28, %s3301_s18  }
  0x59   : > { %s3304_s29 = smov [#allocation20]   ;;  %s3305_s19 = smov [#allocation7]  }
  0x5a   : > { %s572_s30 = sshll.u32 %s3304_s29, 4  ;;  %s459_s23 = sshll.u32 %s3305_s19, 4  ;;  %s573_s30 = int_to_ptr.vmem [resolvable:$true] %s572_s30  ;;  %s460_s23 = int_to_ptr.vmem [resolvable:$true] %s459_s23 }
  0x5b   : > { %s2978_s21 = scalar_lea.vmem %s573_s30, 128  ;;  %p2986_p10 = scmp.lt.s32.totalorder %s573_s30, %s573_s30 }
  0x5c   : > { %p2979_p5 = scmp.ne.s32.totalorder %s573_s30, %s2978_s21  ;;  %p2987_p11 = scmp.lt.s32.totalorder %s2978_s21, %s2978_s21 }
  0x5e   : > { %p2981_p8 = pnand %p2979_p5, %p3456_p7  ;;  %p2988_p12 = por %p2987_p11, %p2986_p10 }
  0x60   : > { %p2982_p9 = pneg %p2981_p8 }
  0x62   : > { %p2989_p0 = pnand %p2988_p12, %p2982_p9 }
  0x64   : > { %2992 = shalt.err (!%p2989_p0)
}
  0x65   : > { %2718 = dma.hbm_to_vmem [thread:$0]  (!%p3448_p6), %s3904_s13, 128, %s573_s30, [#allocation21]  }
  0x66   : > { %s3004_s20 = scalar_lea.vmem %s460_s23, 16  ;;  %s3011_s11 = scalar_lea.vmem %s460_s23, 32 }
  0x67   : > { %p3005_p13 = scmp.ne.s32.totalorder %s460_s23, %s3004_s20  ;;  %p3012_p5 = scmp.lt.s32.totalorder %s460_s23, %s460_s23 }
  0x68   : > { %p3013_p8 = scmp.lt.s32.totalorder %s3011_s11, %s3004_s20 }
  0x69   : > { %p3007_p2 = pnand %p3005_p13, %p3456_p7 }
  0x6a   : > { %p3014_p1 = por %p3013_p8, %p3012_p5 }
  0x6b   : > { %p3008_p4 = pneg %p3007_p2 }
  0x6d   : > { %p3015_p10 = pnand %p3014_p1, %p3008_p4 }
  0x6f   : > { %3018 = shalt.err (!%p3015_p10)
}
  0x70   : > { %s3936_s2 = sld [smem:[#allocation38_spill]]  ;;  %s3306_s30 = smov [#allocation10]  }
  0x71   : > { %s481_s19 = sshll.u32 %s3306_s30, 4  ;;  %s3307_s21 = smov [#allocation13]   ;;  %s482_s19 = int_to_ptr.vmem [resolvable:$true] %s481_s19 }
  0x72   : > { %s503_s14 = sshll.u32 %s3307_s21, 4  ;;  %s3030_s12 = scalar_lea.vmem %s482_s19, 16  ;;  %s504_s14 = int_to_ptr.vmem [resolvable:$true] %s503_s14 }
  0x73   : > { %p3031_p9 = scmp.ne.s32.totalorder %s482_s19, %s3030_s12  ;;  %s3037_s20 = scalar_lea.vmem %s482_s19, 32 }
  0x74   : > { %p3038_p1 = scmp.lt.s32.totalorder %s482_s19, %s482_s19  ;;  %p3039_p4 = scmp.lt.s32.totalorder %s3037_s20, %s3030_s12 }
  0x75   : > { %p3033_p11 = pnand %p3031_p9, %p3456_p7 }
  0x76   : > { %2691 = dma.hbm_to_vmem [thread:$0]  (!%p3448_p6), %s3936_s2, 16, %s460_s23, [#allocation6]  }
  0x77   : > { %p3034_p12 = pneg %p3033_p11  ;;  %p3040_p0 = por %p3039_p4, %p3038_p1 }
  0x79   : > { %p3041_p13 = pnand %p3040_p0, %p3034_p12 }
  0x7b   : > { %3044 = shalt.err (!%p3041_p13)
}
  0x7c   : > { %s3937_s4 = sld [smem:[#allocation40_spill]]  ;;  %s3056_s17 = scalar_lea.vmem %s504_s14, 16 }
  0x7d   : > { %p3057_p2 = scmp.ne.s32.totalorder %s504_s14, %s3056_s17  ;;  %s3063_s29 = scalar_lea.vmem %s504_s14, 32 }
  0x7e   : > { %p3064_p10 = scmp.lt.s32.totalorder %s504_s14, %s504_s14  ;;  %p3065_p9 = scmp.lt.s32.totalorder %s3063_s29, %s3056_s17 }
  0x7f   : > { %p3059_p5 = pnand %p3057_p2, %p3456_p7 }
  0x80   : > { %p3066_p11 = por %p3065_p9, %p3064_p10 }
  0x81   : > { %p3060_p8 = pneg %p3059_p5 }
  0x82   : > { %2697 = dma.hbm_to_vmem [thread:$0]  (!%p3448_p6), %s3937_s4, 16, %s482_s19, [#allocation9]  }
  0x83   : > { %p3067_p1 = pnand %p3066_p11, %p3060_p8 }
  0x85   : > { %3070 = shalt.err (!%p3067_p1)
}
  0x86   : > { %s3938_s6 = sld [smem:[#allocation42_spill]]  ;;  %s3308_s19 = smov [#allocation16]  }
  0x87   : > { %s526_s12 = sshll.u32 %s3308_s19, 4  ;;  %s3309_s20 = smov [#allocation19]   ;;  %s527_s12 = int_to_ptr.vmem [resolvable:$true] %s526_s12 }
  0x88   : > { %s552_s11 = sshll.u32 %s3309_s20, 4  ;;  %s3082_s23 = scalar_lea.vmem %s527_s12, 512  ;;  %s553_s11 = int_to_ptr.vmem [resolvable:$true] %s552_s11 }
  0x89   : > { %p3083_p12 = scmp.ne.s32.totalorder %s527_s12, %s3082_s23  ;;  %p3090_p13 = scmp.lt.s32.totalorder %s527_s12, %s527_s12 }
  0x8a   : > { %p3091_p2 = scmp.lt.s32.totalorder %s3082_s23, %s3082_s23 }
  0x8b   : > { %p3085_p4 = pnand %p3083_p12, %p3456_p7 }
  0x8c   : > { %2703 = dma.hbm_to_vmem [thread:$0]  (!%p3448_p6), %s3938_s6, 16, %s504_s14, [#allocation12]  }
  0x8d   : > { %p3086_p0 = pneg %p3085_p4  ;;  %p3092_p5 = por %p3091_p2, %p3090_p13 }
  0x8f   : > { %p3093_p8 = pnand %p3092_p5, %p3086_p0 }
  0x91   : > { %3096 = shalt.err (!%p3093_p8)
}
  0x92   : > { %2709 = dma.hbm_to_vmem [thread:$0]  (!%p3448_p6), %s3899_s8, 512, %s527_s12, [#allocation15], %s3300_s28, %s3300_s28, %s3301_s18  }
  0x93   : > { %s3108_s29 = scalar_lea.vmem %s553_s11, 512  ;;  %p3116_p1 = scmp.lt.s32.totalorder %s553_s11, %s553_s11 }
  0x94   : > { %p3109_p10 = scmp.ne.s32.totalorder %s553_s11, %s3108_s29  ;;  %p3117_p12 = scmp.lt.s32.totalorder %s3108_s29, %s3108_s29 }
  0x96   : > { %p3111_p9 = pnand %p3109_p10, %p3456_p7  ;;  %p3118_p4 = por %p3117_p12, %p3116_p1 }
  0x98   : > { %p3112_p11 = pneg %p3111_p9 }
  0x9a   : > { %p3119_p0 = pnand %p3118_p4, %p3112_p11 }
  0x9c   : > { %3122 = shalt.err (!%p3119_p0)
}
  0x9d   : > { %2715 = dma.hbm_to_vmem [thread:$0]  (!%p3448_p6), %s3901_s10, 512, %s553_s11, [#allocation18], %s3300_s28, %s3300_s28, %s3301_s18  }
  0x9e   : > { %s3310_s19 = smov [#allocation22]   ;;  %s3311_s20 = smov [#allocation23]  }
  0x9f   : > { %s586_s12 = sshll.u32 %s3310_s19, 4  ;;  %s596_s23 = sshll.u32 %s3311_s20, 4  ;;  %s587_s12 = int_to_ptr.vmem [resolvable:$true] %s586_s12  ;;  %s597_s23 = int_to_ptr.vmem [resolvable:$true] %s596_s23 }
  0xa0   : > { %s3134_s14 = scalar_lea.vmem %s587_s12, 128  ;;  %p3142_p8 = scmp.lt.s32.totalorder %s587_s12, %s587_s12 }
  0xa1   : > { %p3135_p13 = scmp.ne.s32.totalorder %s587_s12, %s3134_s14  ;;  %p3143_p10 = scmp.lt.s32.totalorder %s3134_s14, %s3134_s14 }
  0xa3   : > { %p3137_p2 = pnand %p3135_p13, %p3456_p7  ;;  %p3144_p9 = por %p3143_p10, %p3142_p8 }
  0xa5   : > { %p3138_p5 = pneg %p3137_p2 }
  0xa7   : > { %p3145_p11 = pnand %p3144_p9, %p3138_p5 }
  0xa9   : > { %3148 = shalt.err (!%p3145_p11)
}
  0xaa   : > { %2721 = dma.hbm_to_vmem [thread:$0]  (!%p3448_p6), %s3906_s15, 128, %s587_s12, [#allocation21]  }
  0xab   : > { %s3160_s11 = scalar_lea.vmem %s597_s23, 1024  ;;  %p3168_p0 = scmp.lt.s32.totalorder %s597_s23, %s597_s23 }
  0xac   : > { %p3161_p1 = scmp.ne.s32.totalorder %s597_s23, %s3160_s11  ;;  %p3169_p13 = scmp.lt.s32.totalorder %s3160_s11, %s3160_s11 }
  0xae   : > { %p3163_p12 = pnand %p3161_p1, %p3456_p7  ;;  %p3170_p2 = por %p3169_p13, %p3168_p0 }
  0xb0   : > { %p3164_p4 = pneg %p3163_p12 }
  0xb2   : > { %p3171_p3 = pnand %p3170_p2, %p3164_p4 }
  0xb4   : > { %3174 = shalt.err (!%p3171_p3)
}
  0xb5   : > { %2724 = dma.hbm_to_vmem [thread:$0]  (!%p3448_p6), %s3907_s16, 1024, %s597_s23, [#allocation24], %s3300_s28, %s3300_s28, %s3301_s18  }
  0xb6   : > { %s2322_s1 = sadd.s32 4294967294, %s3295_s27   ;;  %s3577_s22 = sadd.s32 1, %s3295_s27  }
  0xb7   : > { %s47_s19 = sadd.s32 1, %s3291_s26  ;;  %s44_s12 = ssub.s32 %s3295_s27, %s3577_s22 }
  0xb8   : > { %p54_p3 = scmp.ne.s32.totalorder %s3291_s26, %s3287_s25  ;;  %p45_p7 = scmp.eq.s32.totalorder %s44_s12, 0 }
  0xb9   : > { %p55_p5 = scmp.eq.s32.totalorder %s3295_s27, 0  ;;  %p60_p8 = scmp.ne.s32.totalorder %s3287_s25, %s3283_s24 }
  0xba   : > { %p420_p10 = scmp.eq.s32.totalorder %s3434_s0, 1  ;;  %p3939_p11 = scmp.eq.s32.totalorder %s3434_s0, 0 }
  0xbb   : > { %s3589_s20 = scalar_select %p45_p7, %s3291_s26, %s47_s19  }
  0xbc   : > { %p56_p9 = por %p55_p5, %p54_p3  ;;  %p3593_p1 = por %p3939_p11, %p60_p8 }
  0xbd   : > { %p3597_p6 = por %p420_p10, %p54_p3  ;;  %p426_p12 = scmp.eq.s32.totalorder %s2322_s1, 1 }
  0xbe   : > { %s3940_s14 = scalar_select %p3593_p1, 1, 0 }
  0xbf   : > { %s3941_s28 = scalar_select %p3597_p6, 1, 0 }
  0xc0   : > { %p2746_p4 = scmp.lt.s32.totalorder %s3295_s27, 2  ;;  %s610_s18 = sand.u32 1, %s3291_s26  }
  0xc1   : > { %p3603_p0 = por %p426_p12, %p60_p8  ;;  %s2338_s17 = sshll.u32 %s610_s18, 3 }
  0xc2   : > { %s2339_s29 = sshll.u32 %s3295_s27, 7  ;;  %s3943_s21 = sld [smem:[#allocation36_spill]] }
  0xc3   : > { %s3942_s23 = scalar_select %p3603_p0, 1, 0 }
  0xc4   : > { %s614_s12 = scalar_lea.vmem [#allocation2], %s2338_s17  ;;  %p3613_p13 = pnand %p2746_p4, %p56_p9 }
  0xc5   : > { %s621_s2 = sshll.u32 %s614_s12, 4  ;;  %s611_s3 = scalar_lea.sflag [#allocation3], %s610_s18  ;;  %s622_s2 = int_to_ptr.vmem [resolvable:$true] %s621_s2 }
  0xc6   : > { %p3177_p3 = pneg %p3613_p13 }
  0xc8   : > { %s3611_s19 = scalar_lea.hbm %s3943_s21, %s2339_s29  ;;  %s3180_s30 = scalar_lea.hbm %s3943_s21, 256 }
  0xc9   : > { %s3175_s4 = scalar_lea.hbm %s3611_s19, 128  ;;  %p3181_p8 = scmp.lt.s32.totalorder %s3611_s19, %s3943_s21 }
  0xca   : > { %p3176_p2 = scmp.ne.s32.totalorder %s3611_s19, %s3175_s4  ;;  %p3182_p10 = scmp.lt.s32.totalorder %s3180_s30, %s3175_s4 }
  0xcc   : > { %p3178_p7 = pnand %p3177_p3, %p3176_p2  ;;  %p3183_p9 = por %p3182_p10, %p3181_p8 }
  0xce   : > { %p3179_p5 = pneg %p3178_p7 }
  0xd0   : > { %p3184_p11 = pnand %p3183_p9, %p3179_p5 }
  0xd2   : > { %3187 = shalt.err (!%p3184_p11)
}
  0xd3   : > { %s3188_s12 = scalar_lea.vmem %s622_s2, 128  ;;  %s3312_s18 = smov [#allocation2]  }
  0xd4   : > { %p3189_p12 = scmp.ne.s32.totalorder %s622_s2, %s3188_s12  ;;  %s3193_s6 = sshll.u32 %s3312_s18, 4  ;;  %s3194_s6 = int_to_ptr.vmem [resolvable:$false] %s3193_s6 }
  0xd5   : > { %s3195_s7 = scalar_lea.vmem %s3194_s6, 256  ;;  %p3196_p2 = scmp.lt.s32.totalorder %s622_s2, %s3194_s6 }
  0xd6   : > { %p3191_p4 = pnand %p3189_p12, %p3177_p3  ;;  %p3197_p7 = scmp.lt.s32.totalorder %s3195_s7, %s3188_s12 }
  0xd8   : > { %p3192_p0 = pneg %p3191_p4  ;;  %p3198_p6 = por %p3197_p7, %p3196_p2 }
  0xda   : > { %p3199_p1 = pnand %p3198_p6, %p3192_p0 }
  0xdc   : > { %3202 = shalt.err (!%p3199_p1)
}
  0xdd   : > { %2728 = dma.hbm_to_vmem [thread:$0]  (!%p3613_p13), %s3611_s19, 128, %s622_s2, %s611_s3  }
  0xde   : > { %s3945_s4 = sld [smem:[#allocation35_spill]] }
  0xe4   : > { %p3946_p5 = scmp.ne.s32.totalorder %s3945_s4, 0 }
  0xe5   : > { %s3634_s5 = sand.u32 (!%p3946_p5), 1, %s3287_s25   ;;  %p3947_p1 = scmp.ne.s32.totalorder (!%p3946_p5), %s3940_s14, 0 }
  0xe6   : > { %630 = sbr.rel (%p3946_p5) target bundleno = 3474 (0xd92), region = 88  ;;  %s2341_s29 = sshll.u32 (!%p3946_p5), %s3634_s5, 3 }
  0xe7   : > { %s633_s6 = scalar_lea.sflag (!%p3946_p5), [#allocation3], %s3634_s5  ;;  %s3640_s7 = scalar_lea.vmem (!%p3946_p5), [#allocation2], %s2341_s29 }
  0xeb   : > { %3246 = dma.done.wait (%p3947_p1), %s633_s6, 128  }
  0xec   : > { %3248 = vsyncadd (%p3947_p1), %s633_s6, 4294967168  ;;  %p3948_p6 = scmp.eq.s32.totalorder %s3434_s0, 0 }
  0xee   : > { %3250 = dma.done.wait (%p3948_p6), [#allocation6], 1040   ;;  %p3949_p0 = pmov %p3948_p6 }
  0xf0   : > { %3252 = vsyncadd (%p3949_p0), [#allocation6], 4294966256  ;;  %p3950_p13 = pmov %p3949_p0 }
  0xf1   : > { %p3951_p3 = pmov %p3949_p0 }
  0xf2   : > { %3254 = dma.done.wait (%p3950_p13), [#allocation9], 32  }
  0xf3   : > { %3256 = vsyncadd (%p3951_p3), [#allocation9], 4294967264  ;;  %p3952_p8 = pmov %p3949_p0 }
  0xf4   : > { %p3953_p10 = pmov %p3949_p0 }
  0xf5   : > { %3258 = dma.done.wait (%p3952_p8), [#allocation12], 32  }
  0xf6   : > { %3260 = vsyncadd (%p3953_p10), [#allocation12], 4294967264  ;;  %p3954_p9 = pmov %p3949_p0 }
  0xf7   : > { %p3955_p11 = pmov %p3949_p0 }
  0xf8   : > { %3262 = dma.done.wait (%p3954_p9), [#allocation15], 1536  }
  0xf9   : > { %3264 = vsyncadd (%p3955_p11), [#allocation15], 4294965760  ;;  %p3956_p12 = pmov %p3949_p0 }
  0xfa   : > { %p3957_p4 = pmov %p3949_p0 }
  0xfb   : > { %3266 = dma.done.wait (%p3956_p12), [#allocation18], 1536  }
  0xfc   : > { %3268 = vsyncadd (%p3957_p4), [#allocation18], 4294965760  ;;  %p3958_p2 = pmov %p3949_p0 }
  0xfd   : > { %p3959_p7 = pmov %p3949_p0 }
  0xfe   : > { %3270 = dma.done.wait (%p3958_p2), [#allocation21], 256  }
  0xff   : > { %3272 = vsyncadd (%p3959_p7), [#allocation21], 4294967040  ;;  %p3960_p5 = pmov %p3949_p0 }
 0x100   : > { %p3961_p1 = pmov %p3949_p0 }
 0x101   : > { %3274 = dma.done.wait (%p3960_p5), [#allocation24], 1024  }
 0x102   : > { %3276 = vsyncadd (%p3961_p1), [#allocation24], 4294966272  ;;  %v3313_v0 = vmov 0.0   ;;  %vm3314_vm0 = vmmov 0   ;;  %v747_v1 = vld [vmem:[#allocation5 + $0x38] sm:$0xff]  ;;  %v746_v2 = vld [vmem:[#allocation5 + $0x30] sm:$0xff] }
 0x103   : > { %2461 = vmatprep.subr.mxu0 %v3313_v0  ;;  %2477 = vmatprep.mubr.msk.f32.mxu0 %vm3314_vm0, %v3313_v0  ;;  %v745_v3 = vld [vmem:[#allocation5 + $0x28] sm:$0xff]  ;;  %v835_v5 = vld [vmem:[#allocation14 + $0x30] sm:$0xff]  ;;  %v834_v7 = vld [vmem:[#allocation14 + $0x28] sm:$0xff]  ;;  %vm755_vm1 = vcmask 523264   ;;  %s3315_s2 = smov 64   ;;  %vm1009_vm2 = vcmask 261120  }
 0x104   : > { %2480 = vmatprep.subr.mxu1 %v3313_v0  ;;  %2496 = vmatprep.mubr.msk.f32.mxu1 %vm3314_vm0, %v3313_v0  ;;  %v836_v4 = vld [vmem:[#allocation14 + $0x38] sm:$0xff]  ;;  %v743_v8 = vld [vmem:[#allocation5 + $0x18] sm:$0xff]  ;;  %v833_v9 = vld [vmem:[#allocation14 + $0x20] sm:$0xff]  ;;  %s3962_s19 = sld [smem:[#allocation44_spill]]  ;;  %s3316_s4 = smov 32   ;;  %vm1371_vm3 = vcmask 130048  }
 0x105   : > { %2462 = vmatpush3.msra.mxu0 %v747_v1  ;;  %v744_v6 = vld [vmem:[#allocation5 + $0x20] sm:$0xff]  ;;  %2481 = vmatpush3.msra.mxu1 %v836_v4  ;;  %v742_v10 = vld [vmem:[#allocation5 + $0x10] sm:$0xff]  ;;  %v741_v12 = vld [vmem:[#allocation5 + $0x8] sm:$0xff]  ;;  %s3963_s30 = sld [smem:[#allocation45_spill]]  ;;  %s3317_s6 = smov 112   ;;  %vm1447_vm4 = vcmask 64512  }
 0x106   : > { %2463 = vmatprep.subr.mxu0 %v3313_v0  ;;  %2482 = vmatprep.subr.mxu1 %v3313_v0  ;;  %v832_v11 = vld [vmem:[#allocation14 + $0x18] sm:$0xff]  ;;  %v831_v13 = vld [vmem:[#allocation14 + $0x10] sm:$0xff]  ;;  %v830_v16 = vld [vmem:[#allocation14 + $0x8] sm:$0xff]  ;;  %s3964_s18 = sld [smem:[#allocation46_spill]]  ;;  %s3320_s3 = smov 96   ;;  %vm2030_vm5 = vcmask 392192  }
 0x107   : > { %2464 = vmatpush3.msra.mxu0 %v746_v2  ;;  %2483 = vmatpush3.msra.mxu1 %v835_v5  ;;  %v740_v14 = vld [vmem:[#allocation5] sm:$0xff]  ;;  %v739_v15 = vld [vmem:[%s3640_s7] sm:$0xff]  ;;  %s3318_s7 = smov 48   ;;  %s3321_s14 = smov 16  }
 0x108   : > { %2465 = vmatprep.subr.mxu0 %v3313_v0  ;;  %2484 = vmatprep.subr.mxu1 %v3313_v0  ;;  %v829_v17 = vld [vmem:[#allocation14] sm:$0xff]  ;;  %v2356_v18 = vld [vmem:[#allocation7] ss:$0 sm:$0xff]  ;;  %v1006_v21 = vld [vmem:[#allocation16 + $0x18] sm:$0xff]  ;;  %s738_s1 = scalar_lea.vmem [#allocation25], %s2341_s29  ;;  %s3965_s12 = sld [smem:[#allocation47_spill]] }
 0x109   : > { %2466 = vmatpush3.msra.mxu0 %v745_v3  ;;  %2485 = vmatpush3.msra.mxu1 %v834_v7  ;;  %v1005_v23 = vld [vmem:[#allocation16 + $0x10] sm:$0xff]  ;;  %v1004_v24 = vld [vmem:[#allocation16 + $0x8] sm:$0xff]  ;;  %v1003_v25 = vld [vmem:[#allocation16] sm:$0xff]  ;;  %s2128_s11 = sshll.u32 %s738_s1, 4  ;;  %p3966_p0 = scmp.ne.s32.totalorder %s3941_s28, 0  ;;  %s3849_s11 = int_to_ptr.vmem [resolvable:$true] %s2128_s11 }
 0x10a   : > { %2467 = vmatprep.subr.mxu0 %v3313_v0  ;;  %2486 = vmatprep.subr.mxu1 %v3313_v0  ;;  %v1198_v31 = vld [vmem:[#allocation17 + $0x38] sm:$0xff]  ;;  %v1197_v32 = vld [vmem:[#allocation17 + $0x30] sm:$0xff]  ;;  %v1196_v33 = vld [vmem:[#allocation17 + $0x28] sm:$0xff] }
 0x10b   : > { %2468 = vmatpush3.msra.mxu0 %v744_v6  ;;  %2487 = vmatpush3.msra.mxu1 %v833_v9  ;;  %v1195_v34 = vld [vmem:[#allocation17 + $0x20] sm:$0xff]  ;;  %v1194_v35 = vld [vmem:[#allocation17 + $0x18] sm:$0xff]  ;;  %v1193_v36 = vld [vmem:[#allocation17 + $0x10] sm:$0xff] }
 0x10c   : > { %2469 = vmatprep.subr.mxu0 %v3313_v0  ;;  %2488 = vmatprep.subr.mxu1 %v3313_v0  ;;  %v1192_v37 = vld [vmem:[#allocation17 + $0x8] sm:$0xff]  ;;  %v1191_v38 = vld [vmem:[#allocation17] sm:$0xff]  ;;  %v2360_v45 = vld [vmem:[#allocation8] ss:$0 sm:$0xff] }
 0x10d   : > { %2470 = vmatpush3.msra.mxu0 %v743_v8  ;;  %2489 = vmatpush3.msra.mxu1 %v832_v11  ;;  %v2361_v47 = vld [vmem:[#allocation10] ss:$0 sm:$0xff]  ;;  %v1189_v54 = vld [vmem:[%s3962_s19] sm:$0xff]  ;;  %v2364_v61 = vld [vmem:[#allocation11] ss:$0 sm:$0xff]  ;;  %s2382_s19 = sshll.u32 %s3434_s0, 7 }
 0x10e   : > { %2471 = vmatprep.subr.mxu0 %v3313_v0  ;;  %2490 = vmatprep.subr.mxu1 %v3313_v0  ;;  %v1272_v55 = vld [vmem:[%s3963_s30] sm:$0xff]  ;;  %v1284_v2 = vld [vmem:[#allocation19 + $0x18] sm:$0xff]  ;;  %v1283_v3 = vld [vmem:[#allocation19 + $0x10] sm:$0xff]  ;;  %s3322_s0 = smov [#allocation25]  }
 0x10f   : > { %2472 = vmatpush3.msra.mxu0 %v742_v10  ;;  %2491 = vmatpush3.msra.mxu1 %v831_v13  ;;  %v1281_v6 = vld [vmem:[#allocation19] sm:$0xff]  ;;  %s3207_s29 = sshll.u32 %s3322_s0, 4  ;;  %s3208_s29 = int_to_ptr.vmem [resolvable:$false] %s3207_s29 }
 0x110   : > { %2473 = vmatprep.subr.mxu0 %v3313_v0  ;;  %2492 = vmatprep.subr.mxu1 %v3313_v0  ;;  %v1275_v8 = vld [vmem:[#allocation20] sm:$0xff]  ;;  %p3210_p8 = scmp.lt.s32.totalorder %s3849_s11, %s3208_s29 }
 0x111   : > { %2474 = vmatpush3.msra.mxu0 %v741_v12  ;;  %2493 = vmatpush3.msra.mxu1 %v830_v16 }
 0x112   : > { %2475 = vmatprep.subr.mxu0 %v3313_v0  ;;  %2494 = vmatprep.subr.mxu1 %v3313_v0 }
 0x113   : > { %2476 = vmatpush3.msra.mxu0 %v740_v14  ;;  %2495 = vmatpush3.msra.mxu1 %v829_v17 }
 0x114   : > { %2478 = vmatmul.mubr.msk.f32.vlgmr.msra.gmra.mxu0 %vm755_vm1, %v739_v15  ;;  %2499 = vmatprep.subr.mxu0 %v3313_v0 }
 0x115   : > { %2500 = vmatpush3.msra.mxu0 %v836_v4  ;;  %2515 = vmatprep.mubr.msk.f32.mxu0 %vm3314_vm0, %v3313_v0  ;;  %v1282_v4 = vld [vmem:[#allocation19 + $0x8] sm:$0xff] }
 0x116   : > { %2501 = vmatprep.subr.mxu0 %v3313_v0  ;;  %2518 = vmatprep.subr.mxu1 %v3313_v0 }
 0x117   : > { %2502 = vmatpush3.msra.mxu0 %v835_v5 }
 0x118   : > { %2503 = vmatprep.subr.mxu0 %v3313_v0 }
 0x119   : > { %2504 = vmatpush3.msra.mxu0 %v834_v7  ;;  %v2365_v7 = vld [vmem:[#allocation13] ss:$0 sm:$0xff] }
 0x11a   : > { %2505 = vmatprep.subr.mxu0 %v3313_v0 }
 0x11b   : > { %2506 = vmatpush3.msra.mxu0 %v833_v9 }
 0x11c   : > { %2507 = vmatprep.subr.mxu0 %v3313_v0 }
 0x11d   : > { %2508 = vmatpush3.msra.mxu0 %v832_v11 }
 0x11e   : > { %2509 = vmatprep.subr.mxu0 %v3313_v0 }
 0x11f   : > { %2510 = vmatpush3.msra.mxu0 %v831_v13 }
 0x120   : > { %2511 = vmatprep.subr.mxu0 %v3313_v0 }
 0x121   : > { %2512 = vmatpush3.msra.mxu0 %v830_v16  ;;  %v1360_v16 = vld [vmem:[%s3964_s18] sm:$0xff]  ;;  %s3847_s18 = scalar_lea.hbm %s3965_s12, %s2382_s19 }
 0x122   : > { %2513 = vmatprep.subr.mxu0 %v3313_v0 }
 0x123   : > { %2514 = vmatpush3.msra.mxu0 %v829_v17 }
 0x124   : > { %2540 = vmatprep.subr.mxu0 %v3313_v0 }
 0x1d4   : > { %v825_v19 = vpop.f32.mrf.mxu0 }
 0x1d5   : > { %v3708_v20 = vadd.f32 %v2356_v18, %v825_v19 }
 0x1d6   : > { %v2479_v22 = vpop.f32.mrf.mxu0 }
 0x1d7   : > { %1007 = vrot.lane.b32.xlu0 %v3708_v20, %s3315_s2  ;;  %2497 = vmatmul.mubr.msk.f32.vlgmr.msra.gmra.mxu1 %vm755_vm1, %v3708_v20 }
 0x1d8   : > { %2519 = vmatpush3.msra.mxu1 %v1006_v21  ;;  %2526 = vmatprep.mubr.msk.f32.mxu1 %vm3314_vm0, %v3313_v0 }
 0x1d9   : > { %2520 = vmatprep.subr.mxu1 %v3313_v0 }
 0x1da   : > { %2521 = vmatpush3.msra.mxu1 %v1005_v23 }
 0x1db   : > { %2522 = vmatprep.subr.mxu1 %v3313_v0 }
 0x1dc   : > { %2523 = vmatpush3.msra.mxu1 %v1004_v24 }
 0x1dd   : > { %2524 = vmatprep.subr.mxu1 %v3313_v0 }
 0x1de   : > { %2525 = vmatpush3.msra.mxu1 %v1003_v25 }
 0x1df   : > { %2529 = vmatprep.subr.mxu1 %v3313_v0 }
 0x249   : > { %v1008_v26 = vpop.permute.xlu0 %1007 }
 0x24a   : > { %2527 = vmatmul.mubr.msk.f32.vlgmr.msra.gmra.mxu1 %vm1009_vm2, %v1008_v26 }
 0x24b   : > { %2530 = vmatpush3.msra.mxu1 %v1006_v21  ;;  %2537 = vmatprep.mubr.msk.f32.mxu1 %vm3314_vm0, %v3313_v0 }
 0x24c   : > { %2531 = vmatprep.subr.mxu1 %v3313_v0 }
 0x24d   : > { %2532 = vmatpush3.msra.mxu1 %v1005_v23 }
 0x24e   : > { %2533 = vmatprep.subr.mxu1 %v3313_v0 }
 0x24f   : > { %2534 = vmatpush3.msra.mxu1 %v1004_v24 }
 0x250   : > { %2535 = vmatprep.subr.mxu1 %v3313_v0 }
 0x251   : > { %2536 = vmatpush3.msra.mxu1 %v1003_v25 }
 0x252   : > { %2559 = vmatprep.subr.mxu1 %v3313_v0 }
 0x297   : > { %v906_v27 = vpop.f32.mrf.mxu1 }
 0x298   : > { %v910_v28 = vsub.f32 %v3708_v20, %v906_v27  ;;  %v1367_v27 = vld [vmem:[#allocation22] sm:$0xff] }
 0x299   : > { %v2498_v29 = vpop.f32.mrf.mxu1 }
 0x29a   : > { %v911_v30 = vmul.f32 %v910_v28, %v910_v28 }
 0x29c   : > { %2516 = vmatmul.mubr.msk.f32.vlgmr.msra.gmra.mxu0 %vm755_vm1, %v911_v30 }
 0x29d   : > { %2556 = vmatprep.mubr.msk.f32.mxu0 %vm3314_vm0, %v3313_v0  ;;  %2541 = vmatpush3.msra.mxu0 %v1198_v31 }
 0x29e   : > { %2542 = vmatprep.subr.mxu0 %v3313_v0 }
 0x29f   : > { %2543 = vmatpush3.msra.mxu0 %v1197_v32 }
 0x2a0   : > { %2544 = vmatprep.subr.mxu0 %v3313_v0 }
 0x2a1   : > { %2545 = vmatpush3.msra.mxu0 %v1196_v33 }
 0x2a2   : > { %2546 = vmatprep.subr.mxu0 %v3313_v0 }
 0x2a3   : > { %2547 = vmatpush3.msra.mxu0 %v1195_v34 }
 0x2a4   : > { %2548 = vmatprep.subr.mxu0 %v3313_v0 }
 0x2a5   : > { %2549 = vmatpush3.msra.mxu0 %v1194_v35 }
 0x2a6   : > { %2550 = vmatprep.subr.mxu0 %v3313_v0 }
 0x2a7   : > { %2551 = vmatpush3.msra.mxu0 %v1193_v36 }
 0x2a8   : > { %2552 = vmatprep.subr.mxu0 %v3313_v0 }
 0x2a9   : > { %2553 = vmatpush3.msra.mxu0 %v1192_v37 }
 0x2aa   : > { %2554 = vmatprep.subr.mxu0 %v3313_v0 }
 0x2ab   : > { %2555 = vmatpush3.msra.mxu0 %v1191_v38 }
 0x2ac   : > { %2600 = vmatprep.subr.mxu0 %v3313_v0 }
 0x30a   : > { %v1078_v39 = vpop.f32.mrf.mxu1 }
 0x30b   : > { %1083 = vrot.lane.b32.xlu0 %v1078_v39, %s3315_s2 }
 0x30c   : > { %v2528_v40 = vpop.f32.mrf.mxu1 }
 0x30f   : > { %1175 = vrot.lane.b32.xlu0 %v2364_v61, %s3315_s2 }
 0x35c   : > { %v981_v41 = vpop.f32.mrf.mxu0 }
 0x35d   : > { %v982_v42 = vadd.f32 1e-05, %v981_v41 }
 0x35e   : > { %v2517_v43 = vpop.f32.mrf.mxu0 }
 0x35f   : > { %2817 = vrsqrt.f32 %v982_v42 }
 0x36c   : > { %v2818_v44 = vpop.eup %2817 }
 0x36d   : > { %v986_v46 = vmul.f32 %v2818_v44, %v910_v28 }
 0x36f   : > { %v994_v48 = vmul.f32 %v2360_v45, %v986_v46 }
 0x371   : > { %v1002_v49 = vadd.f32 %v2361_v47, %v994_v48 }
 0x373   : > { %2557 = vmatmul.mubr.msk.f32.vlgmr.msra.gmra.mxu0 %vm755_vm1, %v1002_v49  ;;  %v1190_v57 = vmul.f32 %v1189_v54, %v1002_v49 }
 0x374   : > { %2602 = vmatprep.mubr.msk.f32.mxu0 %vm3314_vm0, %v3313_v0 }
 0x37d   : > { %v1084_v50 = vpop.permute.xlu0 %1083 }
 0x37e   : > { %v1086_v51 = vsub.f32 %v3708_v20, %v1084_v50 }
 0x380   : > { %v1087_v52 = vmul.f32 %v1086_v51, %v1086_v51 }
 0x381   : > { %v1176_v10 = vpop.permute.xlu0 %1175 }
 0x382   : > { %1089 = vrot.lane.b32.xlu1 %v1087_v52, %s3315_s2 }
 0x3f4   : > { %v1090_v53 = vpop.permute.xlu1 %1089 }
 0x3f5   : > { %2538 = vmatmul.mubr.msk.f32.vlgmr.msra.gmra.mxu1 %vm1009_vm2, %v1090_v53 }
 0x3f6   : > { %2567 = vmatprep.mubr.msk.f32.mxu1 %vm3314_vm0, %v3313_v0  ;;  %2560 = vmatpush3.msra.mxu1 %v1284_v2 }
 0x3f7   : > { %2561 = vmatprep.subr.mxu1 %v3313_v0 }
 0x3f8   : > { %2562 = vmatpush3.msra.mxu1 %v1283_v3 }
 0x3f9   : > { %2563 = vmatprep.subr.mxu1 %v3313_v0 }
 0x3fa   : > { %2564 = vmatpush3.msra.mxu1 %v1282_v4 }
 0x3fb   : > { %2565 = vmatprep.subr.mxu1 %v3313_v0 }
 0x3fc   : > { %2566 = vmatpush3.msra.mxu1 %v1281_v6 }
 0x3fd   : > { %2570 = vmatprep.subr.mxu1 %v3313_v0 }
 0x433   : > { %v1268_v56 = vpop.f32.mrf.mxu0 }
 0x434   : > { %v1273_v58 = vmul.f32 %v1272_v55, %v1268_v56 }
 0x435   : > { %v2558_v59 = vpop.f32.mrf.mxu0 }
 0x436   : > { %v3754_v60 = vadd.f32 %v1273_v58, %v1190_v57 }
 0x4b5   : > { %v1159_v62 = vpop.f32.mrf.mxu1 }
 0x4b6   : > { %v1160_v63 = vadd.f32 1e-05, %v1159_v62 }
 0x4b7   : > { %v2539_v1 = vpop.f32.mrf.mxu1 }
 0x4b8   : > { %2819 = vrsqrt.f32 %v1160_v63 }
 0x4c5   : > { %v2820_v5 = vpop.eup %2819 }
 0x4c6   : > { %1165 = vrot.lane.b32.xlu1 %v2820_v5, %s3315_s2 }
 0x4ca   : > { %1185 = vrot.lane.b32.xlu1 %v2365_v7, %s3315_s2 }
 0x4ce   : > { %1277 = vrot.lane.b32.xlu1 %v1275_v8, %s3315_s2 }
 0x538   : > { %v1166_v9 = vpop.permute.xlu1 %1165 }
 0x539   : > { %v1168_v11 = vmul.f32 %v1166_v9, %v1086_v51 }
 0x53b   : > { %v1178_v12 = vmul.f32 %v1176_v10, %v1168_v11 }
 0x53c   : > { %v1186_v13 = vpop.permute.xlu1 %1185 }
 0x53d   : > { %v1188_v14 = vadd.f32 %v1186_v13, %v1178_v12  ;;  %v2039_v12 = vld [vmem:[#allocation23 + $0x38] sm:$0xff]  ;;  %v2038_v13 = vld [vmem:[#allocation23 + $0x30] sm:$0xff] }
 0x53f   : > { %1286 = vrot.lane.b32.xlu0 %v1188_v14, %s3315_s2 }
 0x540   : > { %v1278_v21 = vpop.permute.xlu1 %1277 }
 0x541   : > { %v1280_v22 = vmul.f32 %v1278_v21, %v1188_v14  ;;  %v2037_v14 = vld [vmem:[#allocation23 + $0x28] sm:$0xff] }
 0x542   : > { %v2033_v21 = vld [vmem:[#allocation23 + $0x8] sm:$0xff] }
 0x5b1   : > { %v1287_v15 = vpop.permute.xlu0 %1286 }
 0x5b2   : > { %2568 = vmatmul.mubr.msk.f32.vlgmr.msra.gmra.mxu1 %vm1009_vm2, %v1287_v15  ;;  %v2036_v15 = vld [vmem:[#allocation23 + $0x20] sm:$0xff] }
 0x5b3   : > { %2572 = vmatprep.mubr.msk.f32.mxu1 %vm3314_vm0, %v3313_v0 }
 0x672   : > { %v1356_v17 = vpop.f32.mrf.mxu1 }
 0x673   : > { %v1361_v18 = vmul.f32 %v1360_v16, %v1356_v17  ;;  %v2035_v16 = vld [vmem:[#allocation23 + $0x18] sm:$0xff] }
 0x674   : > { %v2569_v19 = vpop.f32.mrf.mxu1 }
 0x675   : > { %1363 = vrot.lane.b32.xlu0 %v1361_v18, %s3315_s2  ;;  %v2034_v19 = vld [vmem:[#allocation23 + $0x10] sm:$0xff] }
 0x6e7   : > { %v1364_v23 = vpop.permute.xlu0 %1363 }
 0x6e8   : > { %v1366_v24 = vadd.f32 %v1364_v23, %v1280_v22  ;;  %v2032_v22 = vld [vmem:[#allocation23] sm:$0xff] }
 0x6ea   : > { %1369 = vrot.lane.b32.xlu1 %v1366_v24, %s3315_s2  ;;  %s3319_s2 = smov 80  }
 0x6ee   : > { %1458 = vrot.lane.b32.xlu1 %v3708_v20, %s3316_s4 }
 0x6f2   : > { %1535 = vrot.lane.b32.xlu1 %v3754_v60, %s3317_s6  ;;  %s3203_s6 = scalar_lea.vmem %s3849_s11, 128 }
 0x6f3   : > { %p3204_p6 = scmp.ne.s32.totalorder %s3849_s11, %s3203_s6 }
 0x6f5   : > { %p3205_p13 = pnand %p3204_p6, %p3966_p0 }
 0x6f7   : > { %p3206_p3 = pneg %p3205_p13 }
 0x75c   : > { %v1370_v25 = vpop.permute.xlu1 %1369 }
 0x75d   : > { %2571 = vmatpush3.xpose.msk.msra.mxu1 %vm1371_vm3, %v1370_v25 }
 0x75e   : > { %2575 = vmatprep.subr.mxu1 %v3313_v0 }
 0x760   : > { %v1459_v26 = vpop.permute.xlu1 %1458  ;;  %2573 = vmatmul.mubr.msk.f32.vlgmr.msra.gmra.mxu1 %vm1371_vm3, %v3754_v60 }
 0x761   : > { %2576 = vmatpush3.msra.mxu1 %v1459_v26  ;;  %2577 = vmatprep.mubr.msk.f32.mxu1 %vm3314_vm0, %v3313_v0 }
 0x762   : > { %2580 = vmatprep.subr.mxu1 %v3313_v0 }
 0x764   : > { %v1536_v38 = vpop.permute.xlu1 %1535 }
 0x820   : > { %v1443_v28 = vpop.f32.mrf.mxu1 }
 0x821   : > { %v1444_v29 = vadd.f32 %v1443_v28, %v1367_v27 }
 0x822   : > { %v2574_v30 = vpop.f32.mrf.mxu1 }
 0x823   : > { %v1448_v31 = vsel %vm1447_vm4, %v1444_v29, -inf }
 0x824   : > { %1449 = vmax.xlane.f32.xlu0 %v1448_v31 }
 0x83a   : > { %1695 = vrot.lane.b32.xlu0 %v1366_v24, %s3318_s7 }
 0x83e   : > { %1858 = vrot.lane.b32.xlu0 %v3754_v60, %s3319_s2 }
 0x8ad   : > { %v1450_v32 = vpop.xlane.xlu0 %1449 }
 0x8ae   : > { %v1451_v33 = vsub.f32 %v1444_v29, %v1450_v32 }
 0x8b0   : > { %v1452_v34 = vmul.f32 1.442695, %v1451_v33 }
 0x8b1   : > { %v1696_v35 = vpop.permute.xlu0 %1695 }
 0x8b2   : > { %2821 = vpow2.f32 %v1452_v34  ;;  %2601 = vmatpush3.xpose.msk.msra.mxu0 %vm1371_vm3, %v1696_v35 }
 0x8b3   : > { %2610 = vmatprep.subr.mxu0 %v3313_v0 }
 0x8b5   : > { %v1859_v36 = vpop.permute.xlu0 %1858 }
 0x8b6   : > { %2603 = vmatmul.mubr.msk.f32.vlgmr.msra.gmra.mxu0 %vm1371_vm3, %v1859_v36 }
 0x8b7   : > { %2626 = vmatprep.mubr.msk.f32.mxu0 %vm3314_vm0, %v3313_v0  ;;  %2611 = vmatpush3.msra.mxu0 %v2039_v12 }
 0x8b8   : > { %2612 = vmatprep.subr.mxu0 %v3313_v0 }
 0x8b9   : > { %2613 = vmatpush3.msra.mxu0 %v2038_v13 }
 0x8ba   : > { %2614 = vmatprep.subr.mxu0 %v3313_v0 }
 0x8bb   : > { %2615 = vmatpush3.msra.mxu0 %v2037_v14 }
 0x8bc   : > { %2616 = vmatprep.subr.mxu0 %v3313_v0 }
 0x8bd   : > { %2617 = vmatpush3.msra.mxu0 %v2036_v15 }
 0x8be   : > { %2618 = vmatprep.subr.mxu0 %v3313_v0 }
 0x8bf   : > { %v3791_v37 = vpop.eup %2821  ;;  %2619 = vmatpush3.msra.mxu0 %v2035_v16 }
 0x8c0   : > { %2578 = vmatmul.mubr.msk.f32.vlgmr.msra.gmra.mxu1 %vm1447_vm4, %v3791_v37  ;;  %v1454_v11 = vsel %vm1447_vm4, %v3791_v37, 0.0  ;;  %2620 = vmatprep.subr.mxu0 %v3313_v0 }
 0x8c1   : > { %2581 = vmatpush3.xpose.msk.msra.mxu1 %vm1371_vm3, %v1370_v25  ;;  %2582 = vmatprep.mubr.msk.f32.mxu1 %vm3314_vm0, %v3313_v0 }
 0x8c2   : > { %2585 = vmatprep.subr.mxu1 %v3313_v0  ;;  %2621 = vmatpush3.msra.mxu0 %v2034_v19 }
 0x8c3   : > { %2622 = vmatprep.subr.mxu0 %v3313_v0 }
 0x8c4   : > { %2583 = vmatmul.mubr.msk.f32.vlgmr.msra.gmra.mxu1 %vm1371_vm3, %v1536_v38  ;;  %2623 = vmatpush3.msra.mxu0 %v2033_v21 }
 0x8c5   : > { %2586 = vmatpush3.msra.mxu1 %v1459_v26  ;;  %2587 = vmatprep.mubr.msk.f32.mxu1 %vm3314_vm0, %v3313_v0 }
 0x8c6   : > { %2590 = vmatprep.subr.mxu1 %v3313_v0  ;;  %2624 = vmatprep.subr.mxu0 %v3313_v0 }
 0x8c7   : > { %2625 = vmatpush3.msra.mxu0 %v2032_v22 }
 0x976   : > { %v1928_v39 = vpop.f32.mrf.mxu0 }
 0x977   : > { %v1929_v47 = vadd.f32 %v1928_v39, %v1367_v27 }
 0x978   : > { %v2604_v40 = vpop.f32.mrf.mxu0 }
 0x979   : > { %v1932_v48 = vsel %vm1447_vm4, %v1929_v47, -inf }
 0x980   : > { %v3803_v41 = vpop.f32.mrf.mxu1 }
 0x982   : > { %v2579_v42 = vpop.f32.mrf.mxu1 }
 0x984   : > { %v1605_v43 = vpop.f32.mrf.mxu1 }
 0x985   : > { %v1606_v44 = vadd.f32 %v1605_v43, %v1367_v27 }
 0x986   : > { %v2584_v45 = vpop.f32.mrf.mxu1 }
 0x987   : > { %v1609_v46 = vsel %vm1447_vm4, %v1606_v44, -inf }
 0x988   : > { %1610 = vmax.xlane.f32.xlu1 %v1609_v46 }
 0x999   : > { %1693 = vrot.lane.b32.xlu1 %v3754_v60, %s3320_s3 }
 0x9bd   : > { %1933 = vmax.xlane.f32.xlu1 %v1932_v48 }
 0xa11   : > { %v1611_v49 = vpop.xlane.xlu1 %1610 }
 0xa12   : > { %v1612_v50 = vsub.f32 %v1606_v44, %v1611_v49 }
 0xa14   : > { %v1613_v51 = vmul.f32 1.442695, %v1612_v50 }
 0xa15   : > { %v1694_v54 = vpop.permute.xlu1 %1693 }
 0xa16   : > { %2823 = vpow2.f32 %v1613_v51 }
 0xa23   : > { %v2824_v52 = vpop.eup %2823 }
 0xa24   : > { %2588 = vmatmul.mubr.msk.f32.vlgmr.msra.gmra.mxu1 %vm1447_vm4, %v2824_v52  ;;  %v1615_v53 = vsel %vm1447_vm4, %v2824_v52, 0.0 }
 0xa25   : > { %2591 = vmatpush3.xpose.msk.msra.mxu1 %vm1371_vm3, %v1696_v35  ;;  %1616 = vadd.xlane.f32.xlu1 %v1615_v53 }
 0xa26   : > { %2592 = vmatprep.mubr.msk.f32.mxu1 %vm3314_vm0, %v3313_v0  ;;  %2595 = vmatprep.subr.mxu1 %v3313_v0 }
 0xa28   : > { %2593 = vmatmul.mubr.msk.f32.vlgmr.msra.gmra.mxu1 %vm1371_vm3, %v1694_v54 }
 0xa29   : > { %2597 = vmatprep.mubr.msk.f32.mxu1 %vm3314_vm0, %v3313_v0 }
 0xa46   : > { %v1934_v61 = vpop.xlane.xlu1 %1933 }
 0xa47   : > { %v1935_v2 = vsub.f32 %v1929_v47, %v1934_v61 }
 0xa49   : > { %v1936_v5 = vmul.f32 1.442695, %v1935_v2 }
 0xaae   : > { %v1617_v62 = vpop.xlane.xlu1 %1616 }
 0xaaf   : > { %2825 = vrcp.f32 %v1617_v62 }
 0xabc   : > { %v2826_v63 = vpop.eup %2825 }
 0xae4   : > { %v1688_v55 = vpop.f32.mrf.mxu1 }
 0xae5   : > { %v1692_v1 = vmul.f32 %v2826_v63, %v1688_v55 }
 0xae6   : > { %v2589_v56 = vpop.f32.mrf.mxu1 }
 0xae8   : > { %v1767_v57 = vpop.f32.mrf.mxu1 }
 0xae9   : > { %v1768_v58 = vadd.f32 %v1767_v57, %v1367_v27 }
 0xaea   : > { %v2594_v59 = vpop.f32.mrf.mxu1 }
 0xaeb   : > { %v1771_v60 = vsel %vm1447_vm4, %v1768_v58, -inf }
 0xaec   : > { %1772 = vmax.xlane.f32.xlu0 %v1771_v60 }
 0xb02   : > { %1781 = vrot.lane.b32.xlu0 %v3708_v20, %s3321_s14 }
 0xb06   : > { %2017 = vrot.lane.b32.xlu0 %v1692_v1, %s3321_s14 }
 0xb75   : > { %v1773_v3 = vpop.xlane.xlu0 %1772 }
 0xb76   : > { %v1774_v4 = vsub.f32 %v1768_v58, %v1773_v3 }
 0xb78   : > { %v1775_v6 = vmul.f32 1.442695, %v1774_v4 }
 0xb79   : > { %v1782_v7 = vpop.permute.xlu0 %1781 }
 0xb7a   : > { %2827 = vpow2.f32 %v1775_v6  ;;  %2596 = vmatpush3.msra.mxu1 %v1782_v7 }
 0xb7b   : > { %2605 = vmatprep.subr.mxu1 %v3313_v0  ;;  %2829 = vpow2.f32 %v1936_v5 }
 0xb7d   : > { %v2018_v33 = vpop.permute.xlu0 %2017 }
 0xb87   : > { %v2828_v8 = vpop.eup %2827 }
 0xb88   : > { %2598 = vmatmul.mubr.msk.f32.vlgmr.msra.gmra.mxu1 %vm1447_vm4, %v2828_v8  ;;  %v1777_v9 = vsel %vm1447_vm4, %v2828_v8, 0.0  ;;  %v2830_v20 = vpop.eup %2829 }
 0xb89   : > { %2606 = vmatpush3.msra.mxu1 %v1782_v7  ;;  %1778 = vadd.xlane.f32.xlu1 %v1777_v9  ;;  %v1938_v10 = vsel %vm1447_vm4, %v2830_v20, 0.0 }
 0xb8a   : > { %2607 = vmatprep.mubr.msk.f32.mxu1 %vm3314_vm0, %v3313_v0 }
 0xb8c   : > { %2608 = vmatmul.mubr.msk.f32.vlgmr.msra.gmra.mxu1 %vm1447_vm4, %v2830_v20 }
 0xb8d   : > { %1939 = vadd.xlane.f32.xlu1 %v1938_v10 }
 0xb91   : > { %1455 = vadd.xlane.f32.xlu1 %v1454_v11 }
 0xc12   : > { %v1779_v17 = vpop.xlane.xlu1 %1778 }
 0xc13   : > { %2831 = vrcp.f32 %v1779_v17 }
 0xc16   : > { %v1940_v18 = vpop.xlane.xlu1 %1939 }
 0xc17   : > { %2833 = vrcp.f32 %v1940_v18 }
 0xc1a   : > { %v1456_v31 = vpop.xlane.xlu1 %1455 }
 0xc1b   : > { %2835 = vrcp.f32 %v1456_v31 }
 0xc20   : > { %v2832_v23 = vpop.eup %2831 }
 0xc24   : > { %v2834_v27 = vpop.eup %2833 }
 0xc28   : > { %v2836_v32 = vpop.eup %2835 }
 0xc29   : > { %v1534_v0 = vmul.f32 %v2836_v32, %v3803_v41 }
 0xc2b   : > { %v2028_v35 = vsel %vm1371_vm3, %v1534_v0, %v2018_v33 }
 0xc48   : > { %v1853_v24 = vpop.f32.mrf.mxu1 }
 0xc49   : > { %v1857_v25 = vmul.f32 %v2832_v23, %v1853_v24 }
 0xc4a   : > { %v2599_v26 = vpop.f32.mrf.mxu1 }
 0xc4b   : > { %2021 = vrot.lane.b32.xlu1 %v1857_v25, %s3316_s4  ;;  %s2115_s4 = scalar_lea.sflag [#allocation4], %s3634_s5 }
 0xc4c   : > { %v2011_v28 = vpop.f32.mrf.mxu1 }
 0xc4d   : > { %v2015_v29 = vmul.f32 %v2834_v27, %v2011_v28 }
 0xc4e   : > { %v2609_v30 = vpop.f32.mrf.mxu1 }
 0xc4f   : > { %2025 = vrot.lane.b32.xlu0 %v2015_v29, %s3318_s7  ;;  %s3209_s7 = scalar_lea.vmem %s3208_s29, 256 }
 0xc50   : > { %p3211_p10 = scmp.lt.s32.totalorder %s3209_s7, %s3203_s6 }
 0xc52   : > { %p3212_p9 = por %p3211_p10, %p3210_p8 }
 0xc54   : > { %p3213_p11 = pnand %p3212_p9, %p3206_p3 }
 0xcbd   : > { %v2022_v34 = vpop.permute.xlu1 %2021 }
 0xcbe   : > { %v2029_v36 = vsel %vm1009_vm2, %v2028_v35, %v2022_v34 }
 0xcc1   : > { %v2026_v37 = vpop.permute.xlu0 %2025 }
 0xcc2   : > { %v2031_v38 = vsel %vm2030_vm5, %v2029_v36, %v2026_v37 }
 0xcc3   : > { %2627 = vmatmul.mubr.msk.f32.vlgmr.msra.gmra.mxu0 %vm755_vm1, %v2031_v38 }
 0xd83   : > { %v2109_v39 = vpop.f32.mrf.mxu0 }
 0xd84   : > { %2113 = vst.msk [vmem:[%s738_s1] sm:$0xff] %vm755_vm1, %v2109_v39 }
 0xd85   : > { %v2628_v40 = vpop.f32.mrf.mxu0 }
 0xd86   : > { %3216 = shalt.err (!%p3213_p11)
}
 0xd87   : > { %s3217_s2 = scalar_lea.hbm %s3847_s18, 128  ;;  %s3221_s14 = scalar_lea.hbm %s3965_s12, 256 }
 0xd88   : > { %p3218_p12 = scmp.ne.s32.totalorder %s3847_s18, %s3217_s2  ;;  %p3222_p7 = scmp.lt.s32.totalorder %s3847_s18, %s3965_s12 }
 0xd89   : > { %p3223_p5 = scmp.lt.s32.totalorder %s3221_s14, %s3217_s2 }
 0xd8a   : > { %p3219_p4 = pnand %p3218_p12, %p3966_p0 }
 0xd8b   : > { %p3224_p1 = por %p3223_p5, %p3222_p7 }
 0xd8c   : > { %p3220_p2 = pneg %p3219_p4 }
 0xd8e   : > { %p3225_p6 = pnand %p3224_p1, %p3220_p2 }
 0xd90   : > { %3228 = shalt.err (!%p3225_p6)
}
 0xd91   : > { %2683 = dma.vmem_to_hbm [thread:$0]  (%p3966_p0), %s3849_s11, 128, %s3847_s18, %s2115_s4  }
 0xd92 PF: > { %s2140_s30 = sand.u32 1, %s3283_s24   ;;  %p3967_p13 = scmp.ne.s32.totalorder %s3942_s23, 0 }
 0xd93   : > { %p3968_p3 = scmp.ge.s32.totalorder %s3295_s27, 2  ;;  %s2141_s17 = scalar_lea.sflag [#allocation4], %s2140_s30 }
 0xd95   : > { %p2730_p8 = pnand %p3968_p3, %p3967_p13 }
 0xd97   : > { %p2731_p10 = pneg %p2730_p8 }
 0xd99   : > { %3278 = dma.done.wait (%p2731_p10), %s2141_s17, 128  }
 0xd9a   : > { %3280 = vsyncadd (%p2731_p10), %s2141_s17, 4294967168  ;;  %p37_p9 = scmp.ge.s32.totalorder %s3577_s22, 4   ;;  %s3969_s24 = smov %s3287_s25 }
 0xd9b   : > { %s3970_s25 = smov %s3291_s26  ;;  %s3971_s26 = smov %s3589_s20 }
 0xd9c   : > { %s3972_s27 = smov %s3577_s22  ;;  %39 = sbr.rel (!%p37_p9) target bundleno = 25 (0x19), region = 185 }
 0xda1   :  { %2146 = vsyncpa [#allocation3], 1 }
 0xda2   :  { %2148 = vsyncpa [#allocation3 + $0x1], 1 }
 0xda3   :  { %2149 = vsyncpa [#allocation6], 1 }
 0xda4   :  { %2150 = vsyncpa [#allocation9], 1 }
 0xda5   :  { %2151 = vsyncpa [#allocation12], 1 }
 0xda6   :  { %2152 = vsyncpa [#allocation15], 1 }
 0xda7   :  { %2153 = vsyncpa [#allocation18], 1 }
 0xda8   :  { %2154 = vsyncpa [#allocation21], 1 }
 0xda9   :  { %2155 = vsyncpa [#allocation24], 1 }
 0xdaa   :  { %2156 = vsyncpa [#allocation4], 1 }
 0xdab   :  { %2158 = vsyncpa [#allocation4 + $0x1], 1 }

</bundles_post_ra>
